<compile_context>
chip_gen: v5e
topology: v5e:2x2
jax: 0.10.0
libtpu: 0.0.40
codegen_flags: <defaults>
</compile_context>

<pallas_src>
import math

import jax
import jax.numpy as jnp
from jax import lax
from jax.experimental import pallas as pl
from jax.experimental.pallas import tpu as pltpu

# ---- model configuration (AttentionModel(node_num, embedding_dim, hidden_dim)) ----
BATCH = 2
NODE_NUM = 8
NODE_DIM = 2
EMBED_DIM = 32
N_HEADS = 8
KEY_DIM = EMBED_DIM // N_HEADS
N_LAYERS = 2
FF_HIDDEN = 512          # GraphAttentionEncoder default feed_forward_hidden
TANH_CLIP = 10.0
BN_EPS = 1e-5

ROWS = BATCH * NODE_NUM        # 16 flattened (batch * node) rows
HK = N_HEADS * KEY_DIM         # 32 concatenated head width (== EMBED_DIM)
WIDE = N_HEADS * ROWS          # 128 head-stacked key axis (== vreg lane width)
OUT_PAD = 128                  # padded decoder output width -> lane-dense final store
NEG_BIG = -1e30


def _batchnorm(v, gamma, beta):
    """BatchNorm1d (training mode) over flattened (batch*node, feat); biased variance."""
    mean = jnp.mean(v, axis=0, keepdims=True)
    var = jnp.mean((v - mean) ** 2, axis=0, keepdims=True)
    return (v - mean) * lax.rsqrt(var + BN_EPS) * gamma[None, :] + beta[None, :]


def attention_model_kernel(
    x_ref, wi_ref, bi_ref, ctx_ref,
    bias_ref, hmask_ref,
    wqkv_ref, wo_ref,
    bn1g_ref, bn1b_ref,
    ffw1_ref, ffb1_ref, ffw2_ref, ffb2_ref,
    bn2g_ref, bn2b_ref,
    dw1_ref, db1_ref, dw2_ref, db2_ref, dw3_ref, db3_ref,
    out_ref,
):
    x = x_ref[...]                 # (ROWS, 2)
    wi = wi_ref[...]               # (2, D)

    # init_embed: contraction dim is 2 -> two VPU broadcast-mul-adds (not an MXU matmul),
    # plus bias and the per-node context embedding (pre-tiled over batch on the host).
    h = (x[:, 0:1] * wi[0:1, :] + x[:, 1:2] * wi[1:2, :]
         + bi_ref[...] + ctx_ref[...])                                    # (ROWS, D)

    bias_wide = bias_ref[...]      # (ROWS, WIDE) additive cross-batch mask, tiled over heads
    head_mask = hmask_ref[...]     # (WIDE, HK)   0/1 head block-diagonal selector

    for l in range(N_LAYERS):
        # ----- multi-head self-attention, all heads at once -----
        # fused Q/K/V projection: one matmul per layer; 1/sqrt(K) folded into Wq on the host.
        qkv = jnp.dot(h, wqkv_ref[l], preferred_element_type=jnp.float32)  # (ROWS, 3*HK)
        q = qkv[:, 0:HK]                                                   # (ROWS, HK)
        k = qkv[:, HK:2 * HK]
        v = qkv[:, 2 * HK:3 * HK]

        # head-stacked block-diagonal K / V: row h*ROWS+j carries K[j]/V[j] restricted to head h
        k_bd = jnp.concatenate([k] * N_HEADS, axis=0) * head_mask          # (WIDE, HK)
        v_bd = jnp.concatenate([v] * N_HEADS, axis=0) * head_mask          # (WIDE, HK)

        # scores for all heads in one MXU push; s[i, h*ROWS+j] = q_h[i] . k_h[j]
        s = lax.dot_general(q, k_bd, (((1,), (1,)), ((), ())),
                            preferred_element_type=jnp.float32)            # (ROWS, WIDE)
        s = s + bias_wide                                                  # block-diag batch mask
        m = jnp.max(s, axis=-1, keepdims=True)  # row-global max: valid shift for every head segment
        e = jnp.exp(s - m)                      # masked entries underflow cleanly to 0

        # unnormalized head outputs + per-head softmax denominators, directly in concat-head layout
        u = jnp.dot(e, v_bd, preferred_element_type=jnp.float32)           # (ROWS, HK)
        d = jnp.dot(e, head_mask, preferred_element_type=jnp.float32)      # (ROWS, HK)
        o = u / d                                                          # softmax-normalized heads

        mha = jnp.dot(o, wo_ref[l], preferred_element_type=jnp.float32)    # (ROWS, D)
        h = _batchnorm(h + mha, bn1g_ref[l], bn1b_ref[l])

        # ----- feed-forward (D -> 512 -> D), strictly 2-D matmuls -----
        ff = jnp.dot(h, ffw1_ref[l], preferred_element_type=jnp.float32) + ffb1_ref[l][None, :]
        ff = jnp.maximum(ff, 0.0)
        ff = jnp.dot(ff, ffw2_ref[l], preferred_element_type=jnp.float32) + ffb2_ref[l][None, :]
        h = _batchnorm(h + ff, bn2g_ref[l], bn2b_ref[l])

    # ----- decoder: Linear-ReLU-Linear-ReLU-Linear (final layer padded to 128 lanes) -----
    d1 = jnp.maximum(jnp.dot(h, dw1_ref[...], preferred_element_type=jnp.float32) + db1_ref[...], 0.0)
    d2 = jnp.maximum(jnp.dot(d1, dw2_ref[...], preferred_element_type=jnp.float32) + db2_ref[...], 0.0)
    logits = jnp.dot(d2, dw3_ref[...], preferred_element_type=jnp.float32) + db3_ref[...]  # (ROWS, 128)

    # tanh clipping; lane-dense (16, 128) store (wrapper slices back to node_num columns)
    out_ref[...] = jnp.tanh(logits) * TANH_CLIP


def attention_model_forward(x, params):
    B, N, _ = x.shape
    L, H, D, K = N_LAYERS, N_HEADS, EMBED_DIM, KEY_DIM
    R = B * N

    # ---- one-time host-side parameter prep (weight fusion / scale folding / layout) ----
    scale = 1.0 / math.sqrt(K)

    def cat_heads(w):  # (L, H, D, K) -> (L, D, H*K), head-major columns
        return jnp.transpose(w, (0, 2, 1, 3)).reshape(L, D, H * K)

    wqkv = jnp.concatenate(
        [cat_heads(params['wq'] * scale), cat_heads(params['wk']), cat_heads(params['wv'])],
        axis=-1)                                        # (L, D, 3*H*K): Q|K|V contiguous 32-lane chunks
    wo_cat = params['wo'].reshape(L, H * K, D)          # (L, H*K, D) head-major rows
    ctx_full = jnp.tile(params['ctx'], (B, 1))          # (R, D) context broadcast over batch
    x_flat = x.reshape(R, NODE_DIM)                     # flatten activations once

    # additive cross-batch mask tiled over the head-stacked key axis: (R, H*R)
    batch_id = jnp.arange(R, dtype=jnp.int32) // N
    same = batch_id[:, None] == batch_id[None, :]
    bias = jnp.where(same, 0.0, NEG_BIG).astype(jnp.float32)             # (R, R)
    bias_wide = jnp.tile(bias, (1, H))                                   # (R, H*R)

    # head block-diagonal selector: rows h*R+j, cols h'*K+k -> 1 iff h == h'
    row_head = jnp.arange(H * R, dtype=jnp.int32) // R
    col_head = jnp.arange(H * K, dtype=jnp.int32) // K
    head_mask = (row_head[:, None] == col_head[None, :]).astype(jnp.float32)   # (H*R, H*K)

    # pad the final decoder layer to 128 output lanes for an unmasked (lane-dense) store
    dw3_pad = jnp.zeros((D, OUT_PAD), jnp.float32).at[:, :NODE_NUM].set(params['dw3'])
    db3_pad = jnp.zeros((1, OUT_PAD), jnp.float32).at[:, :NODE_NUM].set(params['db3'])

    inputs = (
        x_flat, params['wi'], params['bi'], ctx_full,
        bias_wide, head_mask,
        wqkv, wo_cat,
        params['bn1g'], params['bn1b'],
        params['ffw1'], params['ffb1'], params['ffw2'], params['ffb2'],
        params['bn2g'], params['bn2b'],
        params['dw1'], params['db1'], params['dw2'], params['db2'],
        dw3_pad, db3_pad,
    )
    vmem = pltpu.MemorySpace.VMEM
    out_pad = pl.pallas_call(
        attention_model_kernel,
        out_shape=jax.ShapeDtypeStruct((R, OUT_PAD), jnp.float32),
        in_specs=[pl.BlockSpec(memory_space=vmem) for _ in inputs],
        out_specs=pl.BlockSpec(memory_space=vmem),
    )(*inputs)
    return out_pad[:, :NODE_NUM].reshape(B, N, NODE_NUM)


def init_params(key):
    """Deterministic synthetic parameters matching the module's shapes."""
    ks = jax.random.split(key, 17)

    def uni(k, shape, bound):
        return jax.random.uniform(k, shape, jnp.float32, -bound, bound)

    D, H, K, F, L, N = EMBED_DIM, N_HEADS, KEY_DIM, FF_HIDDEN, N_LAYERS, NODE_NUM
    p = {}
    # init_embed: Linear(2, D)
    b0 = 1.0 / math.sqrt(NODE_DIM)
    p['wi'] = uni(ks[0], (NODE_DIM, D), b0)
    p['bi'] = uni(ks[1], (1, D), b0)
    # node context embedding
    # TODO(synk): StartEndEmbedding source not provided; modeled as a learned (node_num, D) per-node context.
    p['ctx'] = 0.1 * jax.random.normal(ks[2], (N, D), jnp.float32)
    # encoder layers (stacked over L)
    p['wq'] = uni(ks[3], (L, H, D, K), 1.0 / math.sqrt(K))
    p['wk'] = uni(ks[4], (L, H, D, K), 1.0 / math.sqrt(K))
    p['wv'] = uni(ks[5], (L, H, D, K), 1.0 / math.sqrt(K))
    p['wo'] = uni(ks[6], (L, H, K, D), 1.0 / math.sqrt(D))
    p['bn1g'] = jnp.ones((L, D), jnp.float32)
    p['bn1b'] = jnp.zeros((L, D), jnp.float32)
    bf = 1.0 / math.sqrt(D)
    p['ffw1'] = uni(ks[7], (L, D, F), bf)
    p['ffb1'] = uni(ks[8], (L, F), bf)
    bf2 = 1.0 / math.sqrt(F)
    p['ffw2'] = uni(ks[9], (L, F, D), bf2)
    p['ffb2'] = uni(ks[10], (L, D), bf2)
    p['bn2g'] = jnp.ones((L, D), jnp.float32)
    p['bn2b'] = jnp.zeros((L, D), jnp.float32)
    # decoder
    bd = 1.0 / math.sqrt(D)
    p['dw1'] = uni(ks[11], (D, D), bd)
    p['db1'] = uni(ks[12], (1, D), bd)
    p['dw2'] = uni(ks[13], (D, D), bd)
    p['db2'] = uni(ks[14], (1, D), bd)
    p['dw3'] = uni(ks[15], (D, NODE_NUM), bd)
    p['db3'] = uni(ks[16], (1, NODE_NUM), bd)
    return p


if __name__ == "__main__":
    key = jax.random.PRNGKey(0)
    pkey, xkey = jax.random.split(key)
    params = init_params(pkey)
    x = jax.random.uniform(xkey, (BATCH, NODE_NUM, NODE_DIM), jnp.float32)  # (B, node_num, node_dim=2)

    out = attention_model_forward(x, params)
    out = jax.block_until_ready(out)

    assert out.shape == (BATCH, NODE_NUM, NODE_NUM), out.shape
    assert bool(jnp.all(jnp.isfinite(out)))
    assert bool(jnp.all(jnp.abs(out) <= TANH_CLIP + 1e-4))
    print("KERNEL_OK")
</pallas_src>

<mosaic_0001>
module attributes {stable_mosaic.version = 11 : i64} {
  func.func @attention_model_kernel(%arg0: memref<16x2xf32, #tpu.memory_space<vmem>>, %arg1: memref<2x32xf32, #tpu.memory_space<vmem>>, %arg2: memref<1x32xf32, #tpu.memory_space<vmem>>, %arg3: memref<16x32xf32, #tpu.memory_space<vmem>>, %arg4: memref<16x128xf32, #tpu.memory_space<vmem>>, %arg5: memref<128x32xf32, #tpu.memory_space<vmem>>, %arg6: memref<2x32x96xf32, #tpu.memory_space<vmem>>, %arg7: memref<2x32x32xf32, #tpu.memory_space<vmem>>, %arg8: memref<2x32xf32, #tpu.memory_space<vmem>>, %arg9: memref<2x32xf32, #tpu.memory_space<vmem>>, %arg10: memref<2x32x512xf32, #tpu.memory_space<vmem>>, %arg11: memref<2x512xf32, #tpu.memory_space<vmem>>, %arg12: memref<2x512x32xf32, #tpu.memory_space<vmem>>, %arg13: memref<2x32xf32, #tpu.memory_space<vmem>>, %arg14: memref<2x32xf32, #tpu.memory_space<vmem>>, %arg15: memref<2x32xf32, #tpu.memory_space<vmem>>, %arg16: memref<32x32xf32, #tpu.memory_space<vmem>>, %arg17: memref<1x32xf32, #tpu.memory_space<vmem>>, %arg18: memref<32x32xf32, #tpu.memory_space<vmem>>, %arg19: memref<1x32xf32, #tpu.memory_space<vmem>>, %arg20: memref<32x128xf32, #tpu.memory_space<vmem>>, %arg21: memref<1x128xf32, #tpu.memory_space<vmem>>, %arg22: memref<16x128xf32, #tpu.memory_space<vmem>>) attributes {dimension_semantics = [], scalar_prefetch = 0 : i64, scratch_operands = 0 : i64, tpu.core_type = #tpu.core_type<tc>} {
    %c0 = arith.constant 0 : index
    %c0_0 = arith.constant 0 : index
    %0 = vector.load %arg0[%c0, %c0_0] : memref<16x2xf32, #tpu.memory_space<vmem>>, vector<16x2xf32>
    %c0_1 = arith.constant 0 : index
    %c0_2 = arith.constant 0 : index
    %1 = vector.load %arg1[%c0_1, %c0_2] : memref<2x32xf32, #tpu.memory_space<vmem>>, vector<2x32xf32>
    %2 = vector.extract_strided_slice %0 {offsets = [0, 0], sizes = [16, 1], strides = [1, 1]} : vector<16x2xf32> to vector<16x1xf32>
    %3 = vector.extract_strided_slice %1 {offsets = [0, 0], sizes = [1, 32], strides = [1, 1]} : vector<2x32xf32> to vector<1x32xf32>
    %4 = vector.broadcast %2 : vector<16x1xf32> to vector<16x32xf32>
    %5 = vector.broadcast %3 : vector<1x32xf32> to vector<16x32xf32>
    %6 = arith.mulf %4, %5 : vector<16x32xf32>
    %7 = vector.extract_strided_slice %0 {offsets = [0, 1], sizes = [16, 1], strides = [1, 1]} : vector<16x2xf32> to vector<16x1xf32>
    %8 = vector.extract_strided_slice %1 {offsets = [1, 0], sizes = [1, 32], strides = [1, 1]} : vector<2x32xf32> to vector<1x32xf32>
    %9 = vector.broadcast %7 : vector<16x1xf32> to vector<16x32xf32>
    %10 = vector.broadcast %8 : vector<1x32xf32> to vector<16x32xf32>
    %11 = arith.mulf %9, %10 : vector<16x32xf32>
    %12 = arith.addf %6, %11 : vector<16x32xf32>
    %c0_3 = arith.constant 0 : index
    %c0_4 = arith.constant 0 : index
    %13 = vector.load %arg2[%c0_3, %c0_4] : memref<1x32xf32, #tpu.memory_space<vmem>>, vector<1x32xf32>
    %14 = vector.broadcast %13 : vector<1x32xf32> to vector<16x32xf32>
    %15 = arith.addf %12, %14 : vector<16x32xf32>
    %c0_5 = arith.constant 0 : index
    %c0_6 = arith.constant 0 : index
    %16 = vector.load %arg3[%c0_5, %c0_6] : memref<16x32xf32, #tpu.memory_space<vmem>>, vector<16x32xf32>
    %17 = arith.addf %15, %16 : vector<16x32xf32>
    %c0_7 = arith.constant 0 : index
    %c0_8 = arith.constant 0 : index
    %18 = vector.load %arg4[%c0_7, %c0_8] : memref<16x128xf32, #tpu.memory_space<vmem>>, vector<16x128xf32>
    %c0_9 = arith.constant 0 : index
    %c0_10 = arith.constant 0 : index
    %19 = vector.load %arg5[%c0_9, %c0_10] : memref<128x32xf32, #tpu.memory_space<vmem>>, vector<128x32xf32>
    %c0_11 = arith.constant 0 : index
    %c0_12 = arith.constant 0 : index
    %c0_13 = arith.constant 0 : index
    %20 = vector.load %arg6[%c0_11, %c0_12, %c0_13] : memref<2x32x96xf32, #tpu.memory_space<vmem>>, vector<1x32x96xf32>
    %21 = vector.shape_cast %20 : vector<1x32x96xf32> to vector<32x96xf32>
    %cst = arith.constant dense<0.000000e+00> : vector<16x96xf32>
    %22 = tpu.matmul %17, %21, %cst {dimension_numbers = #tpu.dot_dimension_numbers<[1], [0], [0], [1], [0, 0, 1, 1], [], []>} : vector<16x32xf32>, vector<32x96xf32>, vector<16x96xf32> -> vector<16x96xf32>
    %23 = vector.extract_strided_slice %22 {offsets = [0, 0], sizes = [16, 32], strides = [1, 1]} : vector<16x96xf32> to vector<16x32xf32>
    %24 = vector.extract_strided_slice %22 {offsets = [0, 32], sizes = [16, 32], strides = [1, 1]} : vector<16x96xf32> to vector<16x32xf32>
    %25 = vector.extract_strided_slice %22 {offsets = [0, 64], sizes = [16, 32], strides = [1, 1]} : vector<16x96xf32> to vector<16x32xf32>
    %26 = tpu.concatenate %24, %24, %24, %24, %24, %24, %24, %24 in 0 : vector<16x32xf32>, vector<16x32xf32>, vector<16x32xf32>, vector<16x32xf32>, vector<16x32xf32>, vector<16x32xf32>, vector<16x32xf32>, vector<16x32xf32> -> vector<128x32xf32>
    %27 = arith.mulf %26, %19 : vector<128x32xf32>
    %28 = tpu.concatenate %25, %25, %25, %25, %25, %25, %25, %25 in 0 : vector<16x32xf32>, vector<16x32xf32>, vector<16x32xf32>, vector<16x32xf32>, vector<16x32xf32>, vector<16x32xf32>, vector<16x32xf32>, vector<16x32xf32> -> vector<128x32xf32>
    %29 = arith.mulf %28, %19 : vector<128x32xf32>
    %cst_14 = arith.constant dense<0.000000e+00> : vector<16x128xf32>
    %30 = tpu.matmul %23, %27, %cst_14 {dimension_numbers = #tpu.dot_dimension_numbers<[1], [1], [0], [0], [0, 0, 1, 0], [], []>} : vector<16x32xf32>, vector<128x32xf32>, vector<16x128xf32> -> vector<16x128xf32>
    %31 = arith.addf %30, %18 : vector<16x128xf32>
    %cst_15 = arith.constant dense<0xFF800000> : vector<16xf32>
    %32 = vector.multi_reduction <maximumf>, %31, %cst_15 [1] : vector<16x128xf32> to vector<16xf32>
    %33 = vector.shape_cast %32 : vector<16xf32> to vector<16x1xf32>
    %34 = vector.broadcast %33 : vector<16x1xf32> to vector<16x128xf32>
    %35 = arith.subf %31, %34 : vector<16x128xf32>
    %36 = math.exp %35 : vector<16x128xf32>
    %cst_16 = arith.constant dense<0.000000e+00> : vector<16x32xf32>
    %37 = tpu.matmul %36, %29, %cst_16 {dimension_numbers = #tpu.dot_dimension_numbers<[1], [0], [0], [1], [0, 0, 1, 1], [], []>} : vector<16x128xf32>, vector<128x32xf32>, vector<16x32xf32> -> vector<16x32xf32>
    %cst_17 = arith.constant dense<0.000000e+00> : vector<16x32xf32>
    %38 = tpu.matmul %36, %19, %cst_17 {dimension_numbers = #tpu.dot_dimension_numbers<[1], [0], [0], [1], [0, 0, 1, 1], [], []>} : vector<16x128xf32>, vector<128x32xf32>, vector<16x32xf32> -> vector<16x32xf32>
    %39 = arith.divf %37, %38 : vector<16x32xf32>
    %c0_18 = arith.constant 0 : index
    %c0_19 = arith.constant 0 : index
    %c0_20 = arith.constant 0 : index
    %40 = vector.load %arg7[%c0_18, %c0_19, %c0_20] : memref<2x32x32xf32, #tpu.memory_space<vmem>>, vector<1x32x32xf32>
    %41 = vector.shape_cast %40 : vector<1x32x32xf32> to vector<32x32xf32>
    %cst_21 = arith.constant dense<0.000000e+00> : vector<16x32xf32>
    %42 = tpu.matmul %39, %41, %cst_21 {dimension_numbers = #tpu.dot_dimension_numbers<[1], [0], [0], [1], [0, 0, 1, 1], [], []>} : vector<16x32xf32>, vector<32x32xf32>, vector<16x32xf32> -> vector<16x32xf32>
    %43 = arith.addf %17, %42 : vector<16x32xf32>
    %c0_22 = arith.constant 0 : index
    %c0_23 = arith.constant 0 : index
    %44 = vector.load %arg8[%c0_22, %c0_23] : memref<2x32xf32, #tpu.memory_space<vmem>>, vector<1x32xf32>
    %45 = vector.shape_cast %44 : vector<1x32xf32> to vector<32xf32>
    %c0_24 = arith.constant 0 : index
    %c0_25 = arith.constant 0 : index
    %46 = vector.load %arg9[%c0_24, %c0_25] : memref<2x32xf32, #tpu.memory_space<vmem>>, vector<1x32xf32>
    %47 = vector.shape_cast %46 : vector<1x32xf32> to vector<32xf32>
    %cst_26 = arith.constant dense<0.000000e+00> : vector<32xf32>
    %48 = vector.multi_reduction <add>, %43, %cst_26 [0] : vector<16x32xf32> to vector<32xf32>
    %49 = vector.shape_cast %48 : vector<32xf32> to vector<1x32xf32>
    %cst_27 = arith.constant 1.600000e+01 : f32
    %50 = vector.broadcast %cst_27 : f32 to vector<1x32xf32>
    %51 = arith.divf %49, %50 : vector<1x32xf32>
    %52 = vector.broadcast %51 : vector<1x32xf32> to vector<16x32xf32>
    %53 = arith.subf %43, %52 : vector<16x32xf32>
    %54 = arith.mulf %53, %53 : vector<16x32xf32>
    %cst_28 = arith.constant dense<0.000000e+00> : vector<32xf32>
    %55 = vector.multi_reduction <add>, %54, %cst_28 [0] : vector<16x32xf32> to vector<32xf32>
    %56 = vector.shape_cast %55 : vector<32xf32> to vector<1x32xf32>
    %cst_29 = arith.constant 1.600000e+01 : f32
    %57 = vector.broadcast %cst_29 : f32 to vector<1x32xf32>
    %58 = arith.divf %56, %57 : vector<1x32xf32>
    %59 = vector.broadcast %51 : vector<1x32xf32> to vector<16x32xf32>
    %60 = arith.subf %43, %59 : vector<16x32xf32>
    %cst_30 = arith.constant 9.99999974E-6 : f32
    %61 = vector.broadcast %cst_30 : f32 to vector<1x32xf32>
    %62 = arith.addf %58, %61 : vector<1x32xf32>
    %63 = math.rsqrt %62 : vector<1x32xf32>
    %64 = vector.broadcast %63 : vector<1x32xf32> to vector<16x32xf32>
    %65 = arith.mulf %60, %64 : vector<16x32xf32>
    %66 = vector.shape_cast %45 : vector<32xf32> to vector<1x32xf32>
    %67 = vector.broadcast %66 : vector<1x32xf32> to vector<16x32xf32>
    %68 = arith.mulf %65, %67 : vector<16x32xf32>
    %69 = vector.shape_cast %47 : vector<32xf32> to vector<1x32xf32>
    %70 = vector.broadcast %69 : vector<1x32xf32> to vector<16x32xf32>
    %71 = arith.addf %68, %70 : vector<16x32xf32>
    %c0_31 = arith.constant 0 : index
    %c0_32 = arith.constant 0 : index
    %c0_33 = arith.constant 0 : index
    %72 = vector.load %arg10[%c0_31, %c0_32, %c0_33] : memref<2x32x512xf32, #tpu.memory_space<vmem>>, vector<1x32x512xf32>
    %73 = vector.shape_cast %72 : vector<1x32x512xf32> to vector<32x512xf32>
    %cst_34 = arith.constant dense<0.000000e+00> : vector<16x512xf32>
    %74 = tpu.matmul %71, %73, %cst_34 {dimension_numbers = #tpu.dot_dimension_numbers<[1], [0], [0], [1], [0, 0, 1, 1], [], []>} : vector<16x32xf32>, vector<32x512xf32>, vector<16x512xf32> -> vector<16x512xf32>
    %c0_35 = arith.constant 0 : index
    %c0_36 = arith.constant 0 : index
    %75 = vector.load %arg11[%c0_35, %c0_36] : memref<2x512xf32, #tpu.memory_space<vmem>>, vector<1x512xf32>
    %76 = vector.shape_cast %75 : vector<1x512xf32> to vector<512xf32>
    %77 = vector.shape_cast %76 : vector<512xf32> to vector<1x512xf32>
    %78 = vector.broadcast %77 : vector<1x512xf32> to vector<16x512xf32>
    %79 = arith.addf %74, %78 : vector<16x512xf32>
    %cst_37 = arith.constant 0.000000e+00 : f32
    %80 = vector.broadcast %cst_37 : f32 to vector<16x512xf32>
    %81 = arith.maximumf %79, %80 : vector<16x512xf32>
    %c0_38 = arith.constant 0 : index
    %c0_39 = arith.constant 0 : index
    %c0_40 = arith.constant 0 : index
    %82 = vector.load %arg12[%c0_38, %c0_39, %c0_40] : memref<2x512x32xf32, #tpu.memory_space<vmem>>, vector<1x512x32xf32>
    %83 = vector.shape_cast %82 : vector<1x512x32xf32> to vector<512x32xf32>
    %cst_41 = arith.constant dense<0.000000e+00> : vector<16x32xf32>
    %84 = tpu.matmul %81, %83, %cst_41 {dimension_numbers = #tpu.dot_dimension_numbers<[1], [0], [0], [1], [0, 0, 1, 1], [], []>} : vector<16x512xf32>, vector<512x32xf32>, vector<16x32xf32> -> vector<16x32xf32>
    %c0_42 = arith.constant 0 : index
    %c0_43 = arith.constant 0 : index
    %85 = vector.load %arg13[%c0_42, %c0_43] : memref<2x32xf32, #tpu.memory_space<vmem>>, vector<1x32xf32>
    %86 = vector.shape_cast %85 : vector<1x32xf32> to vector<32xf32>
    %87 = vector.shape_cast %86 : vector<32xf32> to vector<1x32xf32>
    %88 = vector.broadcast %87 : vector<1x32xf32> to vector<16x32xf32>
    %89 = arith.addf %84, %88 : vector<16x32xf32>
    %90 = arith.addf %71, %89 : vector<16x32xf32>
    %c0_44 = arith.constant 0 : index
    %c0_45 = arith.constant 0 : index
    %91 = vector.load %arg14[%c0_44, %c0_45] : memref<2x32xf32, #tpu.memory_space<vmem>>, vector<1x32xf32>
    %92 = vector.shape_cast %91 : vector<1x32xf32> to vector<32xf32>
    %c0_46 = arith.constant 0 : index
    %c0_47 = arith.constant 0 : index
    %93 = vector.load %arg15[%c0_46, %c0_47] : memref<2x32xf32, #tpu.memory_space<vmem>>, vector<1x32xf32>
    %94 = vector.shape_cast %93 : vector<1x32xf32> to vector<32xf32>
    %cst_48 = arith.constant dense<0.000000e+00> : vector<32xf32>
    %95 = vector.multi_reduction <add>, %90, %cst_48 [0] : vector<16x32xf32> to vector<32xf32>
    %96 = vector.shape_cast %95 : vector<32xf32> to vector<1x32xf32>
    %cst_49 = arith.constant 1.600000e+01 : f32
    %97 = vector.broadcast %cst_49 : f32 to vector<1x32xf32>
    %98 = arith.divf %96, %97 : vector<1x32xf32>
    %99 = vector.broadcast %98 : vector<1x32xf32> to vector<16x32xf32>
    %100 = arith.subf %90, %99 : vector<16x32xf32>
    %101 = arith.mulf %100, %100 : vector<16x32xf32>
    %cst_50 = arith.constant dense<0.000000e+00> : vector<32xf32>
    %102 = vector.multi_reduction <add>, %101, %cst_50 [0] : vector<16x32xf32> to vector<32xf32>
    %103 = vector.shape_cast %102 : vector<32xf32> to vector<1x32xf32>
    %cst_51 = arith.constant 1.600000e+01 : f32
    %104 = vector.broadcast %cst_51 : f32 to vector<1x32xf32>
    %105 = arith.divf %103, %104 : vector<1x32xf32>
    %106 = vector.broadcast %98 : vector<1x32xf32> to vector<16x32xf32>
    %107 = arith.subf %90, %106 : vector<16x32xf32>
    %cst_52 = arith.constant 9.99999974E-6 : f32
    %108 = vector.broadcast %cst_52 : f32 to vector<1x32xf32>
    %109 = arith.addf %105, %108 : vector<1x32xf32>
    %110 = math.rsqrt %109 : vector<1x32xf32>
    %111 = vector.broadcast %110 : vector<1x32xf32> to vector<16x32xf32>
    %112 = arith.mulf %107, %111 : vector<16x32xf32>
    %113 = vector.shape_cast %92 : vector<32xf32> to vector<1x32xf32>
    %114 = vector.broadcast %113 : vector<1x32xf32> to vector<16x32xf32>
    %115 = arith.mulf %112, %114 : vector<16x32xf32>
    %116 = vector.shape_cast %94 : vector<32xf32> to vector<1x32xf32>
    %117 = vector.broadcast %116 : vector<1x32xf32> to vector<16x32xf32>
    %118 = arith.addf %115, %117 : vector<16x32xf32>
    %c1 = arith.constant 1 : index
    %c0_53 = arith.constant 0 : index
    %c0_54 = arith.constant 0 : index
    %119 = vector.load %arg6[%c1, %c0_53, %c0_54] : memref<2x32x96xf32, #tpu.memory_space<vmem>>, vector<1x32x96xf32>
    %120 = vector.shape_cast %119 : vector<1x32x96xf32> to vector<32x96xf32>
    %cst_55 = arith.constant dense<0.000000e+00> : vector<16x96xf32>
    %121 = tpu.matmul %118, %120, %cst_55 {dimension_numbers = #tpu.dot_dimension_numbers<[1], [0], [0], [1], [0, 0, 1, 1], [], []>} : vector<16x32xf32>, vector<32x96xf32>, vector<16x96xf32> -> vector<16x96xf32>
    %122 = vector.extract_strided_slice %121 {offsets = [0, 0], sizes = [16, 32], strides = [1, 1]} : vector<16x96xf32> to vector<16x32xf32>
    %123 = vector.extract_strided_slice %121 {offsets = [0, 32], sizes = [16, 32], strides = [1, 1]} : vector<16x96xf32> to vector<16x32xf32>
    %124 = vector.extract_strided_slice %121 {offsets = [0, 64], sizes = [16, 32], strides = [1, 1]} : vector<16x96xf32> to vector<16x32xf32>
    %125 = tpu.concatenate %123, %123, %123, %123, %123, %123, %123, %123 in 0 : vector<16x32xf32>, vector<16x32xf32>, vector<16x32xf32>, vector<16x32xf32>, vector<16x32xf32>, vector<16x32xf32>, vector<16x32xf32>, vector<16x32xf32> -> vector<128x32xf32>
    %126 = arith.mulf %125, %19 : vector<128x32xf32>
    %127 = tpu.concatenate %124, %124, %124, %124, %124, %124, %124, %124 in 0 : vector<16x32xf32>, vector<16x32xf32>, vector<16x32xf32>, vector<16x32xf32>, vector<16x32xf32>, vector<16x32xf32>, vector<16x32xf32>, vector<16x32xf32> -> vector<128x32xf32>
    %128 = arith.mulf %127, %19 : vector<128x32xf32>
    %cst_56 = arith.constant dense<0.000000e+00> : vector<16x128xf32>
    %129 = tpu.matmul %122, %126, %cst_56 {dimension_numbers = #tpu.dot_dimension_numbers<[1], [1], [0], [0], [0, 0, 1, 0], [], []>} : vector<16x32xf32>, vector<128x32xf32>, vector<16x128xf32> -> vector<16x128xf32>
    %130 = arith.addf %129, %18 : vector<16x128xf32>
    %cst_57 = arith.constant dense<0xFF800000> : vector<16xf32>
    %131 = vector.multi_reduction <maximumf>, %130, %cst_57 [1] : vector<16x128xf32> to vector<16xf32>
    %132 = vector.shape_cast %131 : vector<16xf32> to vector<16x1xf32>
    %133 = vector.broadcast %132 : vector<16x1xf32> to vector<16x128xf32>
    %134 = arith.subf %130, %133 : vector<16x128xf32>
    %135 = math.exp %134 : vector<16x128xf32>
    %cst_58 = arith.constant dense<0.000000e+00> : vector<16x32xf32>
    %136 = tpu.matmul %135, %128, %cst_58 {dimension_numbers = #tpu.dot_dimension_numbers<[1], [0], [0], [1], [0, 0, 1, 1], [], []>} : vector<16x128xf32>, vector<128x32xf32>, vector<16x32xf32> -> vector<16x32xf32>
    %cst_59 = arith.constant dense<0.000000e+00> : vector<16x32xf32>
    %137 = tpu.matmul %135, %19, %cst_59 {dimension_numbers = #tpu.dot_dimension_numbers<[1], [0], [0], [1], [0, 0, 1, 1], [], []>} : vector<16x128xf32>, vector<128x32xf32>, vector<16x32xf32> -> vector<16x32xf32>
    %138 = arith.divf %136, %137 : vector<16x32xf32>
    %c1_60 = arith.constant 1 : index
    %c0_61 = arith.constant 0 : index
    %c0_62 = arith.constant 0 : index
    %139 = vector.load %arg7[%c1_60, %c0_61, %c0_62] : memref<2x32x32xf32, #tpu.memory_space<vmem>>, vector<1x32x32xf32>
    %140 = vector.shape_cast %139 : vector<1x32x32xf32> to vector<32x32xf32>
    %cst_63 = arith.constant dense<0.000000e+00> : vector<16x32xf32>
    %141 = tpu.matmul %138, %140, %cst_63 {dimension_numbers = #tpu.dot_dimension_numbers<[1], [0], [0], [1], [0, 0, 1, 1], [], []>} : vector<16x32xf32>, vector<32x32xf32>, vector<16x32xf32> -> vector<16x32xf32>
    %142 = arith.addf %118, %141 : vector<16x32xf32>
    %c1_64 = arith.constant 1 : index
    %c0_65 = arith.constant 0 : index
    %143 = vector.load %arg8[%c1_64, %c0_65] : memref<2x32xf32, #tpu.memory_space<vmem>>, vector<1x32xf32>
    %144 = vector.shape_cast %143 : vector<1x32xf32> to vector<32xf32>
    %c1_66 = arith.constant 1 : index
    %c0_67 = arith.constant 0 : index
    %145 = vector.load %arg9[%c1_66, %c0_67] : memref<2x32xf32, #tpu.memory_space<vmem>>, vector<1x32xf32>
    %146 = vector.shape_cast %145 : vector<1x32xf32> to vector<32xf32>
    %cst_68 = arith.constant dense<0.000000e+00> : vector<32xf32>
    %147 = vector.multi_reduction <add>, %142, %cst_68 [0] : vector<16x32xf32> to vector<32xf32>
    %148 = vector.shape_cast %147 : vector<32xf32> to vector<1x32xf32>
    %cst_69 = arith.constant 1.600000e+01 : f32
    %149 = vector.broadcast %cst_69 : f32 to vector<1x32xf32>
    %150 = arith.divf %148, %149 : vector<1x32xf32>
    %151 = vector.broadcast %150 : vector<1x32xf32> to vector<16x32xf32>
    %152 = arith.subf %142, %151 : vector<16x32xf32>
    %153 = arith.mulf %152, %152 : vector<16x32xf32>
    %cst_70 = arith.constant dense<0.000000e+00> : vector<32xf32>
    %154 = vector.multi_reduction <add>, %153, %cst_70 [0] : vector<16x32xf32> to vector<32xf32>
    %155 = vector.shape_cast %154 : vector<32xf32> to vector<1x32xf32>
    %cst_71 = arith.constant 1.600000e+01 : f32
    %156 = vector.broadcast %cst_71 : f32 to vector<1x32xf32>
    %157 = arith.divf %155, %156 : vector<1x32xf32>
    %158 = vector.broadcast %150 : vector<1x32xf32> to vector<16x32xf32>
    %159 = arith.subf %142, %158 : vector<16x32xf32>
    %cst_72 = arith.constant 9.99999974E-6 : f32
    %160 = vector.broadcast %cst_72 : f32 to vector<1x32xf32>
    %161 = arith.addf %157, %160 : vector<1x32xf32>
    %162 = math.rsqrt %161 : vector<1x32xf32>
    %163 = vector.broadcast %162 : vector<1x32xf32> to vector<16x32xf32>
    %164 = arith.mulf %159, %163 : vector<16x32xf32>
    %165 = vector.shape_cast %144 : vector<32xf32> to vector<1x32xf32>
    %166 = vector.broadcast %165 : vector<1x32xf32> to vector<16x32xf32>
    %167 = arith.mulf %164, %166 : vector<16x32xf32>
    %168 = vector.shape_cast %146 : vector<32xf32> to vector<1x32xf32>
    %169 = vector.broadcast %168 : vector<1x32xf32> to vector<16x32xf32>
    %170 = arith.addf %167, %169 : vector<16x32xf32>
    %c1_73 = arith.constant 1 : index
    %c0_74 = arith.constant 0 : index
    %c0_75 = arith.constant 0 : index
    %171 = vector.load %arg10[%c1_73, %c0_74, %c0_75] : memref<2x32x512xf32, #tpu.memory_space<vmem>>, vector<1x32x512xf32>
    %172 = vector.shape_cast %171 : vector<1x32x512xf32> to vector<32x512xf32>
    %cst_76 = arith.constant dense<0.000000e+00> : vector<16x512xf32>
    %173 = tpu.matmul %170, %172, %cst_76 {dimension_numbers = #tpu.dot_dimension_numbers<[1], [0], [0], [1], [0, 0, 1, 1], [], []>} : vector<16x32xf32>, vector<32x512xf32>, vector<16x512xf32> -> vector<16x512xf32>
    %c1_77 = arith.constant 1 : index
    %c0_78 = arith.constant 0 : index
    %174 = vector.load %arg11[%c1_77, %c0_78] : memref<2x512xf32, #tpu.memory_space<vmem>>, vector<1x512xf32>
    %175 = vector.shape_cast %174 : vector<1x512xf32> to vector<512xf32>
    %176 = vector.shape_cast %175 : vector<512xf32> to vector<1x512xf32>
    %177 = vector.broadcast %176 : vector<1x512xf32> to vector<16x512xf32>
    %178 = arith.addf %173, %177 : vector<16x512xf32>
    %cst_79 = arith.constant 0.000000e+00 : f32
    %179 = vector.broadcast %cst_79 : f32 to vector<16x512xf32>
    %180 = arith.maximumf %178, %179 : vector<16x512xf32>
    %c1_80 = arith.constant 1 : index
    %c0_81 = arith.constant 0 : index
    %c0_82 = arith.constant 0 : index
    %181 = vector.load %arg12[%c1_80, %c0_81, %c0_82] : memref<2x512x32xf32, #tpu.memory_space<vmem>>, vector<1x512x32xf32>
    %182 = vector.shape_cast %181 : vector<1x512x32xf32> to vector<512x32xf32>
    %cst_83 = arith.constant dense<0.000000e+00> : vector<16x32xf32>
    %183 = tpu.matmul %180, %182, %cst_83 {dimension_numbers = #tpu.dot_dimension_numbers<[1], [0], [0], [1], [0, 0, 1, 1], [], []>} : vector<16x512xf32>, vector<512x32xf32>, vector<16x32xf32> -> vector<16x32xf32>
    %c1_84 = arith.constant 1 : index
    %c0_85 = arith.constant 0 : index
    %184 = vector.load %arg13[%c1_84, %c0_85] : memref<2x32xf32, #tpu.memory_space<vmem>>, vector<1x32xf32>
    %185 = vector.shape_cast %184 : vector<1x32xf32> to vector<32xf32>
    %186 = vector.shape_cast %185 : vector<32xf32> to vector<1x32xf32>
    %187 = vector.broadcast %186 : vector<1x32xf32> to vector<16x32xf32>
    %188 = arith.addf %183, %187 : vector<16x32xf32>
    %189 = arith.addf %170, %188 : vector<16x32xf32>
    %c1_86 = arith.constant 1 : index
    %c0_87 = arith.constant 0 : index
    %190 = vector.load %arg14[%c1_86, %c0_87] : memref<2x32xf32, #tpu.memory_space<vmem>>, vector<1x32xf32>
    %191 = vector.shape_cast %190 : vector<1x32xf32> to vector<32xf32>
    %c1_88 = arith.constant 1 : index
    %c0_89 = arith.constant 0 : index
    %192 = vector.load %arg15[%c1_88, %c0_89] : memref<2x32xf32, #tpu.memory_space<vmem>>, vector<1x32xf32>
    %193 = vector.shape_cast %192 : vector<1x32xf32> to vector<32xf32>
    %cst_90 = arith.constant dense<0.000000e+00> : vector<32xf32>
    %194 = vector.multi_reduction <add>, %189, %cst_90 [0] : vector<16x32xf32> to vector<32xf32>
    %195 = vector.shape_cast %194 : vector<32xf32> to vector<1x32xf32>
    %cst_91 = arith.constant 1.600000e+01 : f32
    %196 = vector.broadcast %cst_91 : f32 to vector<1x32xf32>
    %197 = arith.divf %195, %196 : vector<1x32xf32>
    %198 = vector.broadcast %197 : vector<1x32xf32> to vector<16x32xf32>
    %199 = arith.subf %189, %198 : vector<16x32xf32>
    %200 = arith.mulf %199, %199 : vector<16x32xf32>
    %cst_92 = arith.constant dense<0.000000e+00> : vector<32xf32>
    %201 = vector.multi_reduction <add>, %200, %cst_92 [0] : vector<16x32xf32> to vector<32xf32>
    %202 = vector.shape_cast %201 : vector<32xf32> to vector<1x32xf32>
    %cst_93 = arith.constant 1.600000e+01 : f32
    %203 = vector.broadcast %cst_93 : f32 to vector<1x32xf32>
    %204 = arith.divf %202, %203 : vector<1x32xf32>
    %205 = vector.broadcast %197 : vector<1x32xf32> to vector<16x32xf32>
    %206 = arith.subf %189, %205 : vector<16x32xf32>
    %cst_94 = arith.constant 9.99999974E-6 : f32
    %207 = vector.broadcast %cst_94 : f32 to vector<1x32xf32>
    %208 = arith.addf %204, %207 : vector<1x32xf32>
    %209 = math.rsqrt %208 : vector<1x32xf32>
    %210 = vector.broadcast %209 : vector<1x32xf32> to vector<16x32xf32>
    %211 = arith.mulf %206, %210 : vector<16x32xf32>
    %212 = vector.shape_cast %191 : vector<32xf32> to vector<1x32xf32>
    %213 = vector.broadcast %212 : vector<1x32xf32> to vector<16x32xf32>
    %214 = arith.mulf %211, %213 : vector<16x32xf32>
    %215 = vector.shape_cast %193 : vector<32xf32> to vector<1x32xf32>
    %216 = vector.broadcast %215 : vector<1x32xf32> to vector<16x32xf32>
    %217 = arith.addf %214, %216 : vector<16x32xf32>
    %c0_95 = arith.constant 0 : index
    %c0_96 = arith.constant 0 : index
    %218 = vector.load %arg16[%c0_95, %c0_96] : memref<32x32xf32, #tpu.memory_space<vmem>>, vector<32x32xf32>
    %cst_97 = arith.constant dense<0.000000e+00> : vector<16x32xf32>
    %219 = tpu.matmul %217, %218, %cst_97 {dimension_numbers = #tpu.dot_dimension_numbers<[1], [0], [0], [1], [0, 0, 1, 1], [], []>} : vector<16x32xf32>, vector<32x32xf32>, vector<16x32xf32> -> vector<16x32xf32>
    %c0_98 = arith.constant 0 : index
    %c0_99 = arith.constant 0 : index
    %220 = vector.load %arg17[%c0_98, %c0_99] : memref<1x32xf32, #tpu.memory_space<vmem>>, vector<1x32xf32>
    %221 = vector.broadcast %220 : vector<1x32xf32> to vector<16x32xf32>
    %222 = arith.addf %219, %221 : vector<16x32xf32>
    %cst_100 = arith.constant 0.000000e+00 : f32
    %223 = vector.broadcast %cst_100 : f32 to vector<16x32xf32>
    %224 = arith.maximumf %222, %223 : vector<16x32xf32>
    %c0_101 = arith.constant 0 : index
    %c0_102 = arith.constant 0 : index
    %225 = vector.load %arg18[%c0_101, %c0_102] : memref<32x32xf32, #tpu.memory_space<vmem>>, vector<32x32xf32>
    %cst_103 = arith.constant dense<0.000000e+00> : vector<16x32xf32>
    %226 = tpu.matmul %224, %225, %cst_103 {dimension_numbers = #tpu.dot_dimension_numbers<[1], [0], [0], [1], [0, 0, 1, 1], [], []>} : vector<16x32xf32>, vector<32x32xf32>, vector<16x32xf32> -> vector<16x32xf32>
    %c0_104 = arith.constant 0 : index
    %c0_105 = arith.constant 0 : index
    %227 = vector.load %arg19[%c0_104, %c0_105] : memref<1x32xf32, #tpu.memory_space<vmem>>, vector<1x32xf32>
    %228 = vector.broadcast %227 : vector<1x32xf32> to vector<16x32xf32>
    %229 = arith.addf %226, %228 : vector<16x32xf32>
    %cst_106 = arith.constant 0.000000e+00 : f32
    %230 = vector.broadcast %cst_106 : f32 to vector<16x32xf32>
    %231 = arith.maximumf %229, %230 : vector<16x32xf32>
    %c0_107 = arith.constant 0 : index
    %c0_108 = arith.constant 0 : index
    %232 = vector.load %arg20[%c0_107, %c0_108] : memref<32x128xf32, #tpu.memory_space<vmem>>, vector<32x128xf32>
    %cst_109 = arith.constant dense<0.000000e+00> : vector<16x128xf32>
    %233 = tpu.matmul %231, %232, %cst_109 {dimension_numbers = #tpu.dot_dimension_numbers<[1], [0], [0], [1], [0, 0, 1, 1], [], []>} : vector<16x32xf32>, vector<32x128xf32>, vector<16x128xf32> -> vector<16x128xf32>
    %c0_110 = arith.constant 0 : index
    %c0_111 = arith.constant 0 : index
    %234 = vector.load %arg21[%c0_110, %c0_111] : memref<1x128xf32, #tpu.memory_space<vmem>>, vector<1x128xf32>
    %235 = vector.broadcast %234 : vector<1x128xf32> to vector<16x128xf32>
    %236 = arith.addf %233, %235 : vector<16x128xf32>
    %237 = math.tanh %236 : vector<16x128xf32>
    %cst_112 = arith.constant 1.000000e+01 : f32
    %238 = vector.broadcast %cst_112 : f32 to vector<16x128xf32>
    %239 = arith.mulf %237, %238 : vector<16x128xf32>
    %c0_113 = arith.constant 0 : index
    %c0_114 = arith.constant 0 : index
    %240 = vector.load %arg22[%c0_113, %c0_114] : memref<16x128xf32, #tpu.memory_space<vmem>>, vector<16x128xf32>
    tpu.vector_store %arg22[%c0_113, %c0_114], %239 {strides = array<i32>} : memref<16x128xf32, #tpu.memory_space<vmem>>, vector<16x128xf32>,
    return
  }
}

</mosaic_0001>

<bundles_post_ra>
// kernel: tpu_custom_call.1
= control target key start
LH: loop header
LB: loop body
LE: loop exit
PB: predicated region body
PF: predicated region fallthrough
CT: control target
= control target key end

     0   :  { %s3598_s0 = inlined_call_operand.vmem [shape: f32[16,2], index: 0, kind: input, shape index: {}]   ;;  %s3599_s1 = inlined_call_operand.vmem [shape: f32[2,32], index: 1, kind: input, shape index: {}]   ;;  %s3600_s2 = inlined_call_operand.vmem [shape: f32[1,32], index: 2, kind: input, shape index: {}]   ;;  %s3601_s3 = inlined_call_operand.vmem [shape: f32[16,32], index: 3, kind: input, shape index: {}]   ;;  %s3602_s4 = inlined_call_operand.vmem [shape: f32[16,128], index: 4, kind: input, shape index: {}]   ;;  %s3603_s5 = inlined_call_operand.vmem [shape: f32[128,32], index: 5, kind: input, shape index: {}]   ;;  %s3604_s6 = inlined_call_operand.vmem [shape: f32[2,32,96], index: 6, kind: input, shape index: {}]   ;;  %s3605_s7 = inlined_call_operand.vmem [shape: f32[2,32,32], index: 7, kind: input, shape index: {}]   ;;  %s3606_s8 = inlined_call_operand.vmem [shape: f32[2,32], index: 8, kind: input, shape index: {}]   ;;  %s3607_s9 = inlined_call_operand.vmem [shape: f32[2,32], index: 9, kind: input, shape index: {}]   ;;  %s3608_s10 = inlined_call_operand.vmem [shape: f32[2,32,512], index: 10, kind: input, shape index: {}]   ;;  %s3609_s11 = inlined_call_operand.vmem [shape: f32[2,512], index: 11, kind: input, shape index: {}]   ;;  %s3610_s12 = inlined_call_operand.vmem [shape: f32[2,512,32], index: 12, kind: input, shape index: {}]   ;;  %s3611_s13 = inlined_call_operand.vmem [shape: f32[2,32], index: 13, kind: input, shape index: {}]   ;;  %s3612_s14 = inlined_call_operand.vmem [shape: f32[2,32], index: 14, kind: input, shape index: {}]   ;;  %s3613_s15 = inlined_call_operand.vmem [shape: f32[2,32], index: 15, kind: input, shape index: {}]   ;;  %s3614_s16 = inlined_call_operand.vmem [shape: f32[32,32], index: 16, kind: input, shape index: {}]   ;;  %s3615_s17 = inlined_call_operand.vmem [shape: f32[1,32], index: 17, kind: input, shape index: {}]   ;;  %s3616_s18 = inlined_call_operand.vmem [shape: f32[32,32], index: 18, kind: input, shape index: {}]   ;;  %s3617_s19 = inlined_call_operand.vmem [shape: f32[1,32], index: 19, kind: input, shape index: {}]   ;;  %s3618_s20 = inlined_call_operand.vmem [shape: f32[32,128], index: 20, kind: input, shape index: {}]   ;;  %s3619_s21 = inlined_call_operand.vmem [shape: f32[1,128], index: 21, kind: input, shape index: {}]   ;;  %s3620_s22 = inlined_call_operand.hbm [shape: f32[16,128], index: 22, kind: output, shape index: {}]  }
   0x1   :  { %3626 = sst [smem:[#allocation5_spill]] %s3598_s0 }
   0x2   :  { %3627 = sst [smem:[#allocation6_spill]] %s3599_s1 }
   0x3   :  { %3628 = sst [smem:[#allocation7_spill]] %s3600_s2 }
   0x4   :  { %3629 = sst [smem:[#allocation8_spill]] %s3601_s3 }
   0x5   :  { %3630 = sst [smem:[#allocation9_spill]] %s3602_s4 }
   0x6   :  { %3631 = sst [smem:[#allocation10_spill]] %s3603_s5 }
   0x7   :  { %3632 = sst [smem:[#allocation11_spill]] %s3604_s6 }
   0x8   :  { %s3633_s29 = sld [smem:[#allocation5_spill]]  ;;  %v2215_v2 = vmov 0  }
   0x9   :  { %2045 = vset.pattern.permute.xlu1 %v2215_v2  ;;  %2043 = vset.pattern.permute.xlu0 %v2215_v2 }
   0xe   :  { %v73_v0 = vld [vmem:[%s3633_s29 + $0x8] sm:$0xff]  ;;  %v72_v1 = vld [vmem:[%s3633_s29] sm:$0xff] }
   0xf   :  { %82 = vperm.xlu1 %2045, %v73_v0   ;;  %77 = vperm.xlu0 %2043, %v72_v1  }
  0x10   :  { %27 = vsyncpa [#allocation3], 0  ;;  %v2216_v3 = vmov 1   ;;  %s3634_s1 = sld [smem:[#allocation11_spill]]  ;;  %s2217_s2 = smov 32   ;;  %vm133_vm0 = vcmask 261120  }
  0x11   :  { %s3635_s26 = sld [smem:[#allocation10_spill]]  ;;  %s2218_s24 = smov 96  }
  0x12   :  { %s3636_s27 = sld [smem:[#allocation6_spill]] }
  0x13   :  { %s3637_s4 = sld [smem:[#allocation7_spill]] }
  0x14   :  { %s3638_s6 = sld [smem:[#allocation8_spill]] }
  0x16   :  { %v132_v4 = vld [vmem:[%s3634_s1 + $0x18] sm:$0xff]  ;;  %v131_v5 = vld [vmem:[%s3634_s1 + $0x10] sm:$0xff]  ;;  %v130_v7 = vld [vmem:[%s3634_s1 + $0x8] sm:$0xff] }
  0x17   :  { %2046 = vset.pattern.permute.xlu1 %v2216_v3  ;;  %2044 = vset.pattern.permute.xlu0 %v2216_v3  ;;  %v2354_v6 = vld [vmem:[%s3635_s26 + $0x78] sm:$0xff]  ;;  %v129_v8 = vld [vmem:[%s3634_s1] sm:$0xff]  ;;  %v2368_v9 = vld [vmem:[%s3635_s26 + $0x70] sm:$0xff] }
  0x18   :  { %93 = vperm.xlu1 %2046, %v73_v0   ;;  %89 = vperm.xlu0 %2044, %v72_v1   ;;  %v2373_v10 = vld [vmem:[%s3635_s26 + $0x68] sm:$0xff]  ;;  %v2378_v11 = vld [vmem:[%s3635_s26 + $0x58] sm:$0xff]  ;;  %v2391_v12 = vld [vmem:[%s3635_s26 + $0x60] sm:$0xff] }
  0x19   :  { %152 = vmatpush.msra.mxu0 %v132_v4  ;;  %209 = vrot.lane.b32.xlu2 %v2354_v6, %s2217_s2  ;;  %v2396_v13 = vld [vmem:[%s3635_s26 + $0x50] sm:$0xff]  ;;  %v2401_v14 = vld [vmem:[%s3635_s26 + $0x40] sm:$0xff]  ;;  %v2414_v17 = vld [vmem:[%s3635_s26 + $0x38] sm:$0xff] }
  0x1a   :  { %513 = vmatpush.msra.mxu3 %v2354_v6  ;;  %v2419_v18 = vld [vmem:[%s3635_s26 + $0x28] sm:$0xff]  ;;  %v74_v20 = vld [vmem:[%s3636_s27] sm:$0x3]  ;;  %v2442_v23 = vld [vmem:[%s3635_s26 + $0x30] sm:$0xff]  ;;  %s3639_s27 = sld [smem:[#allocation9_spill]] }
  0x1b   :  { %153 = vmatpush.msra.mxu0 %v131_v5  ;;  %v2425_v19 = vld [vmem:[%s3635_s26 + $0x48] sm:$0xff]  ;;  %v85_v21 = vperm.slane %v74_v20, 0  ;;  %v96_v22 = vperm.slane %v74_v20, 1  ;;  %v2127_v27 = vld [vmem:[%s3637_s4] ss:$0 sm:$0xff]  ;;  %v2476_v40 = vld [vmem:[%s3635_s26 + $0x18] sm:$0xff] }
  0x1c   :  { %514 = vmatpush.msra.mxu3 %v2368_v9  ;;  %v2452_v29 = vld [vmem:[%s3635_s26 + $0x20] sm:$0xff]  ;;  %v108_v38 = vld [vmem:[%s3638_s6 + $0x8] sm:$0xff]  ;;  %v2482_v41 = vld [vmem:[%s3635_s26 + $0x10] sm:$0xff] }
  0x1d   :  { %154 = vmatpush.msra.mxu0 %v130_v7  ;;  %v107_v33 = vld [vmem:[%s3638_s6] sm:$0xff]  ;;  %v2488_v42 = vld [vmem:[%s3635_s26 + $0x8] sm:$0xff] }
  0x1e   :  { %515 = vmatpush.msra.mxu3 %v2373_v10  ;;  %v2496_v44 = vld [vmem:[%s3635_s26] sm:$0xff] }
  0x1f   :  { %155 = vmatpush.msra.mxu0 %v129_v8 }
  0x20   :  { %205 = vrot.lane.b32.xlu1 %v2373_v10, %s2217_s2  ;;  %201 = vrot.lane.b32.xlu0 %v2378_v11, %s2217_s2 }
  0x21   :  { %207 = vrot.lane.b32.xlu2 %v2368_v9, %s2217_s2  ;;  %516 = vmatpush.msra.mxu3 %v2391_v12 }
  0x23   :  { %517 = vmatpush.msra.mxu3 %v2378_v11 }
  0x25   :  { %518 = vmatpush.msra.mxu3 %v2396_v13 }
  0x27   :  { %519 = vmatpush.msra.mxu3 %v2425_v19 }
  0x28   :  { %199 = vrot.lane.b32.xlu1 %v2396_v13, %s2217_s2  ;;  %195 = vrot.lane.b32.xlu0 %v2401_v14, %s2217_s2 }
  0x29   :  { %203 = vrot.lane.b32.xlu2 %v2391_v12, %s2217_s2  ;;  %520 = vmatpush.msra.mxu3 %v2401_v14 }
  0x2b   :  { %521 = vmatpush.msra.mxu3 %v2414_v17 }
  0x2d   :  { %522 = vmatpush.msra.mxu3 %v2442_v23 }
  0x2f   :  { %523 = vmatpush.msra.mxu3 %v2419_v18 }
  0x30   :  { %193 = vrot.lane.b32.xlu1 %v2414_v17, %s2217_s2  ;;  %189 = vrot.lane.b32.xlu0 %v2419_v18, %s2217_s2 }
  0x31   :  { %197 = vrot.lane.b32.xlu2 %v2425_v19, %s2217_s2  ;;  %524 = vmatpush.msra.mxu3 %v2452_v29 }
  0x33   :  { %525 = vmatpush.msra.mxu3 %v2476_v40 }
  0x35   :  { %526 = vmatpush.msra.mxu3 %v2482_v41 }
  0x37   :  { %527 = vmatpush.msra.mxu3 %v2488_v42 }
  0x39   :  { %191 = vrot.lane.b32.xlu2 %v2442_v23, %s2217_s2  ;;  %528 = vmatpush.msra.mxu3 %v2496_v44 }
  0x41   :  { %187 = vrot.lane.b32.xlu2 %v2452_v29, %s2217_s2 }
  0x73   :  { %v2491_v43 = vpop.permute.xlu2 %209 }
  0x7b   :  { %v2499_v45 = vpop.permute.xlu2 %207 }
  0x81   :  { %v78_v15 = vpop.permute.xlu0 %77  ;;  %v83_v16 = vpop.permute.xlu1 %82 }
  0x82   :  { %v86_v26 = vmul.f32 %v85_v21, %v78_v15  ;;  %v87_v30 = vmul.f32 %v85_v21, %v83_v16 }
  0x83   :  { %v2510_v50 = vpop.permute.xlu2 %203 }
  0x8a   :  { %v94_v24 = vpop.permute.xlu1 %93  ;;  %v90_v25 = vpop.permute.xlu0 %89 }
  0x8b   :  { %v97_v28 = vmul.f32 %v96_v22, %v90_v25  ;;  %v98_v31 = vmul.f32 %v96_v22, %v94_v24  ;;  %v2524_v55 = vpop.permute.xlu2 %197 }
  0x8d   :  { %v99_v32 = vadd.f32 %v97_v28, %v86_v26  ;;  %v100_v35 = vadd.f32 %v98_v31, %v87_v30 }
  0x8f   :  { %v105_v34 = vadd.f32 %v2127_v27, %v99_v32  ;;  %v106_v37 = vadd.f32 %v2127_v27, %v100_v35 }
  0x91   :  { %v2460_v36 = vadd.f32 %v107_v33, %v105_v34  ;;  %v2469_v39 = vadd.f32 %v108_v38, %v106_v37 }
  0x92   :  { %v2506_v48 = vpop.permute.xlu1 %205  ;;  %v2520_v53 = vpop.permute.xlu0 %201 }
  0x93   :  { %1875 = vmatmul.msk.f32.vlgmr.msra.gmra.mxu0 %vm133_vm0, %v2460_v36  ;;  %v2542_v60 = vpop.permute.xlu2 %191 }
  0x9a   :  { %v2531_v56 = vpop.permute.xlu1 %199  ;;  %v2553_v0 = vpop.permute.xlu0 %195 }
  0x9b   :  { %1876 = vmatmul.msk.f32.gmra.mxu0 %vm133_vm0, %v2469_v39  ;;  %v2556_v1 = vpop.permute.xlu2 %187 }
  0xa2   :  { %v2544_v61 = vpop.permute.xlu1 %193  ;;  %v2564_v4 = vpop.permute.xlu0 %189 }
 0x110   :  { %v2501_v46 = vpop.f32.mrf.mxu0 }
 0x111   :  { %v241_v47 = vmul.f32 %v2499_v45, %v2501_v46  ;;  %v239_v57 = vmul.f32 %v2510_v50, %v2501_v46  ;;  %v237_v59 = vmul.f32 %v2531_v56, %v2501_v46  ;;  %v233_v62 = vmul.f32 %v2542_v60, %v2501_v46 }
 0x112   :  { %v235_v2 = vmul.f32 %v2553_v0, %v2501_v46  ;;  %v231_v3 = vmul.f32 %v2556_v1, %v2501_v46 }
 0x113   :  { %351 = vrot.lane.b32.xlu0 %v241_v47, %s2218_s24 }
 0x118   :  { %v2508_v49 = vpop.f32.mrf.mxu0 }
 0x119   :  { %v242_v51 = vmul.f32 %v2491_v43, %v2508_v49  ;;  %v240_v52 = vmul.f32 %v2506_v48, %v2508_v49  ;;  %v238_v54 = vmul.f32 %v2520_v53, %v2508_v49  ;;  %v236_v58 = vmul.f32 %v2524_v55, %v2508_v49 }
 0x11a   :  { %v234_v63 = vmul.f32 %v2544_v61, %v2508_v49  ;;  %v232_v5 = vmul.f32 %v2564_v4, %v2508_v49 }
 0x11b   :  { %183 = vrot.lane.b32.xlu0 %v2482_v41, %s2217_s2  ;;  %353 = vrot.lane.b32.xlu1 %v242_v51, %s2218_s24 }
 0x11c   :  { %349 = vrot.lane.b32.xlu2 %v240_v52, %s2218_s24 }
 0x123   :  { %185 = vrot.lane.b32.xlu1 %v2476_v40, %s2217_s2  ;;  %345 = vrot.lane.b32.xlu0 %v238_v54, %s2218_s24 }
 0x124   :  { %181 = vrot.lane.b32.xlu2 %v2488_v42, %s2217_s2 }
 0x12b   :  { %347 = vrot.lane.b32.xlu1 %v239_v57, %s2218_s24  ;;  %341 = vrot.lane.b32.xlu0 %v236_v58, %s2218_s24 }
 0x12c   :  { %343 = vrot.lane.b32.xlu2 %v237_v59, %s2218_s24 }
 0x133   :  { %179 = vrot.lane.b32.xlu1 %v2496_v44, %s2217_s2  ;;  %335 = vrot.lane.b32.xlu0 %v233_v62, %s2218_s24  ;;  %s2219_s2 = smov 64  }
 0x134   :  { %337 = vrot.lane.b32.xlu2 %v234_v63, %s2218_s24 }
 0x13b   :  { %339 = vrot.lane.b32.xlu1 %v235_v2, %s2218_s24 }
 0x13c   :  { %331 = vrot.lane.b32.xlu2 %v231_v3, %s2218_s24 }
 0x143   :  { %333 = vrot.lane.b32.xlu1 %v232_v5, %s2218_s24 }
 0x176   :  { %v350_v7 = vpop.permute.xlu2 %349 }
 0x17e   :  { %v2569_v8 = vpop.permute.xlu2 %181 }
 0x17f   :  { %v228_v15 = vmul.f32 %v2569_v8, %v2508_v49 }
 0x181   :  { %325 = vrot.lane.b32.xlu2 %v228_v15, %s2218_s24 }
 0x185   :  { %v352_v16 = vpop.permute.xlu0 %351 }
 0x186   :  { %v344_v26 = vpop.permute.xlu2 %343 }
 0x189   :  { %271 = vrot.lane.b32.xlu2 %v2368_v9, %s2219_s2 }
 0x18d   :  { %v354_v20 = vpop.permute.xlu1 %353  ;;  %v2576_v21 = vpop.permute.xlu0 %183 }
 0x18e   :  { %v229_v22 = vmul.f32 %v2576_v21, %v2501_v46  ;;  %1877 = vmatpush.xpose.msk.msra.mxu1 %vm133_vm0, %v354_v20 }
 0x190   :  { %327 = vrot.lane.b32.xlu1 %v229_v22, %s2218_s24 }
 0x191   :  { %265 = vrot.lane.b32.xlu2 %v2378_v11, %s2219_s2 }
 0x192   :  { %1878 = vmatpush.xpose.msk.msra.mxu1 %vm133_vm0, %v352_v16 }
 0x195   :  { %v2585_v24 = vpop.permute.xlu1 %185  ;;  %v346_v11 = vpop.permute.xlu0 %345 }
 0x196   :  { %v230_v9 = vmul.f32 %v2585_v24, %v2508_v49  ;;  %1879 = vmatpush.xpose.msk.msra.mxu1 %vm133_vm0, %v350_v7 }
 0x198   :  { %329 = vrot.lane.b32.xlu0 %v230_v9, %s2218_s24  ;;  %273 = vrot.lane.b32.xlu1 %v2354_v6, %s2219_s2 }
 0x199   :  { %259 = vrot.lane.b32.xlu2 %v2401_v14, %s2219_s2 }
 0x19d   :  { %v348_v25 = vpop.permute.xlu1 %347  ;;  %v342_v14 = vpop.permute.xlu0 %341 }
 0x19e   :  { %1880 = vmatpush.xpose.msk.msra.mxu1 %vm133_vm0, %v348_v25 }
 0x1a0   :  { %267 = vrot.lane.b32.xlu1 %v2391_v12, %s2219_s2 }
 0x1a1   :  { %253 = vrot.lane.b32.xlu2 %v2419_v18, %s2219_s2  ;;  %v338_v18 = vpop.permute.xlu2 %337 }
 0x1a2   :  { %1881 = vmatpush.xpose.msk.msra.mxu1 %vm133_vm0, %v346_v11 }
 0x1a5   :  { %v2601_v27 = vpop.permute.xlu1 %179  ;;  %v336_v28 = vpop.permute.xlu0 %335 }
 0x1a6   :  { %v227_v6 = vmul.f32 %v2601_v27, %v2501_v46  ;;  %1882 = vmatpush.xpose.msk.msra.mxu1 %vm133_vm0, %v344_v26 }
 0x1a8   :  { %323 = vrot.lane.b32.xlu0 %v227_v6, %s2218_s24  ;;  %261 = vrot.lane.b32.xlu1 %v2425_v19, %s2219_s2 }
 0x1a9   :  { %247 = vrot.lane.b32.xlu2 %v2482_v41, %s2219_s2  ;;  %v332_v30 = vpop.permute.xlu2 %331 }
 0x1aa   :  { %1883 = vmatpush.xpose.msk.msra.mxu1 %vm133_vm0, %v342_v14 }
 0x1ad   :  { %v340_v12 = vpop.permute.xlu1 %339 }
 0x1ae   :  { %1884 = vmatpush.xpose.msk.msra.mxu1 %vm133_vm0, %v340_v12 }
 0x1b0   :  { %269 = vrot.lane.b32.xlu0 %v2373_v10, %s2219_s2  ;;  %255 = vrot.lane.b32.xlu1 %v2442_v23, %s2219_s2 }
 0x1b2   :  { %1885 = vmatpush.xpose.msk.msra.mxu1 %vm133_vm0, %v338_v18 }
 0x1b5   :  { %v334_v19 = vpop.permute.xlu1 %333 }
 0x1b6   :  { %1886 = vmatpush.xpose.msk.msra.mxu1 %vm133_vm0, %v336_v28 }
 0x1b8   :  { %263 = vrot.lane.b32.xlu0 %v2396_v13, %s2219_s2  ;;  %249 = vrot.lane.b32.xlu1 %v2476_v40, %s2219_s2 }
 0x1ba   :  { %1887 = vmatpush.xpose.msk.msra.mxu1 %vm133_vm0, %v334_v19 }
 0x1be   :  { %1888 = vmatpush.xpose.msk.msra.mxu1 %vm133_vm0, %v332_v30 }
 0x1c0   :  { %257 = vrot.lane.b32.xlu0 %v2414_v17, %s2219_s2  ;;  %243 = vrot.lane.b32.xlu1 %v2496_v44, %s2219_s2 }
 0x1c8   :  { %251 = vrot.lane.b32.xlu0 %v2452_v29, %s2219_s2 }
 0x1d0   :  { %245 = vrot.lane.b32.xlu0 %v2488_v42, %s2219_s2 }
 0x1db   :  { %v326_v10 = vpop.permute.xlu2 %325 }
 0x1e3   :  { %v2633_v23 = vpop.permute.xlu2 %271 }
 0x1e4   :  { %v305_v33 = vmul.f32 %v2633_v23, %v2501_v46 }
 0x1eb   :  { %v2656_v42 = vpop.permute.xlu2 %265 }
 0x1ec   :  { %v302_v47 = vmul.f32 %v2656_v42, %v2508_v49 }
 0x1f3   :  { %v2670_v57 = vpop.permute.xlu2 %259 }
 0x1f4   :  { %v299_v59 = vmul.f32 %v2670_v57, %v2501_v46 }
 0x1fb   :  { %v2685_v15 = vpop.permute.xlu2 %253 }
 0x1fc   :  { %v296_v22 = vmul.f32 %v2685_v15, %v2508_v49 }
 0x202   :  { %v328_v13 = vpop.permute.xlu1 %327 }
 0x203   :  { %v2697_v11 = vpop.permute.xlu2 %247 }
 0x204   :  { %v293_v6 = vmul.f32 %v2697_v11, %v2501_v46 }
 0x20a   :  { %v2635_v31 = vpop.permute.xlu1 %273  ;;  %v330_v32 = vpop.permute.xlu0 %329 }
 0x20b   :  { %v306_v17 = vmul.f32 %v2635_v31, %v2508_v49  ;;  %1889 = vmatpush.xpose.msk.msra.mxu1 %vm133_vm0, %v330_v32 }
 0x20d   :  { %v2047_v34 = vpack.i.bf16 %v305_v33, %v306_v17 }
 0x20f   :  { %2048 = vrot.lane.b32.xlu2 %v2047_v34, %s2219_s2  ;;  %1890 = vmatpush.xpose.msk.msra.mxu1 %vm133_vm0, %v328_v13 }
 0x212   :  { %v2648_v35 = vpop.permute.xlu1 %267 }
 0x213   :  { %1891 = vmatpush.xpose.msk.msra.mxu1 %vm133_vm0, %v326_v10  ;;  %v303_v38 = vmul.f32 %v2648_v35, %v2501_v46 }
 0x21a   :  { %v324_v29 = vpop.permute.xlu0 %323  ;;  %v2667_v54 = vpop.permute.xlu1 %261 }
 0x21b   :  { %1892 = vmatpush.xpose.msk.msra.mxu1 %vm133_vm0, %v324_v29  ;;  %v300_v58 = vmul.f32 %v2667_v54, %v2508_v49 }
 0x21d   :  { %v2062_v63 = vpack.i.bf16 %v299_v59, %v300_v58  ;;  %v112_v58 = vld [vmem:[%s3639_s27 + $0x8] sm:$0xff] }
 0x21e   :  { %1893 = vmatmul.msk.f32.vlgmr.msra.gmra.mxu1 %vm133_vm0, %v2501_v46 }
 0x222   :  { %v2650_v37 = vpop.permute.xlu0 %269  ;;  %v2679_v2 = vpop.permute.xlu1 %255 }
 0x223   :  { %v304_v40 = vmul.f32 %v2650_v37, %v2508_v49  ;;  %v297_v5 = vmul.f32 %v2679_v2, %v2501_v46 }
 0x225   :  { %v2052_v41 = vpack.i.bf16 %v303_v38, %v304_v40  ;;  %v111_v38 = vld [vmem:[%s3639_s27] sm:$0xff] }
 0x226   :  { %1894 = vmatmul.msk.f32.gmra.mxu1 %vm133_vm0, %v2508_v49 }
 0x227   :  { %2053 = vrot.lane.b32.xlu1 %v2052_v41, %s2219_s2 }
 0x22a   :  { %v2661_v44 = vpop.permute.xlu0 %263  ;;  %v2694_v25 = vpop.permute.xlu1 %249 }
 0x22b   :  { %v301_v51 = vmul.f32 %v2661_v44, %v2501_v46  ;;  %v294_v26 = vmul.f32 %v2694_v25, %v2508_v49 }
 0x22d   :  { %v2057_v52 = vpack.i.bf16 %v301_v51, %v302_v47  ;;  %v2077_v14 = vpack.i.bf16 %v293_v6, %v294_v26 }
 0x22f   :  { %2058 = vrot.lane.b32.xlu2 %v2057_v52, %s2219_s2 }
 0x232   :  { %v2676_v62 = vpop.permute.xlu0 %257  ;;  %v2706_v18 = vpop.permute.xlu1 %243 }
 0x233   :  { %v298_v3 = vmul.f32 %v2676_v62, %v2508_v49  ;;  %v291_v19 = vmul.f32 %v2706_v18, %v2501_v46 }
 0x235   :  { %v2067_v7 = vpack.i.bf16 %v297_v5, %v298_v3 }
 0x237   :  { %2063 = vrot.lane.b32.xlu2 %v2062_v63, %s2219_s2 }
 0x23a   :  { %v2687_v16 = vpop.permute.xlu0 %251 }
 0x23b   :  { %v295_v20 = vmul.f32 %v2687_v16, %v2501_v46 }
 0x23d   :  { %v2072_v9 = vpack.i.bf16 %v295_v20, %v296_v22 }
 0x23f   :  { %2068 = vrot.lane.b32.xlu2 %v2067_v7, %s2219_s2 }
 0x242   :  { %v2703_v12 = vpop.permute.xlu0 %245 }
 0x243   :  { %v292_v28 = vmul.f32 %v2703_v12, %v2508_v49 }
 0x245   :  { %v2082_v30 = vpack.i.bf16 %v291_v19, %v292_v28 }
 0x247   :  { %2073 = vrot.lane.b32.xlu2 %v2072_v9, %s2219_s2 }
 0x24f   :  { %2078 = vrot.lane.b32.xlu2 %v2077_v14, %s2219_s2 }
 0x257   :  { %2083 = vrot.lane.b32.xlu2 %v2082_v30, %s2219_s2 }
 0x269   :  { %v2049_v10 = vpop.permute.xlu2 %2048 }
 0x26a   :  { %v2050_v13 = vunpack.i.l.bf16 %v2049_v10  ;;  %v2051_v32 = vunpack.i.h.bf16 %v2049_v10 }
 0x26c   :  { %490 = vmatpush.msra.mxu2 %v2050_v13 }
 0x26e   :  { %491 = vmatpush.msra.mxu2 %v2051_v32 }
 0x289   :  { %v2059_v33 = vpop.permute.xlu2 %2058 }
 0x28a   :  { %v2060_v47 = vunpack.i.l.bf16 %v2059_v33  ;;  %v2061_v51 = vunpack.i.h.bf16 %v2059_v33 }
 0x291   :  { %v2064_v17 = vpop.permute.xlu2 %2063 }
 0x292   :  { %v2065_v59 = vunpack.i.l.bf16 %v2064_v17  ;;  %v2066_v5 = vunpack.i.h.bf16 %v2064_v17 }
 0x299   :  { %v2054_v34 = vpop.permute.xlu1 %2053  ;;  %v2069_v29 = vpop.permute.xlu2 %2068 }
 0x29a   :  { %v2055_v49 = vunpack.i.l.bf16 %v2054_v34  ;;  %v2056_v46 = vunpack.i.h.bf16 %v2054_v34  ;;  %v2070_v7 = vunpack.i.l.bf16 %v2069_v29  ;;  %v2071_v20 = vunpack.i.h.bf16 %v2069_v29 }
 0x29b   :  { %v410_v40 = vpop.f32.mrf.mxu1 }
 0x29c   :  { %v411_v41 = vadd.f32 %v410_v40, %v111_v38  ;;  %492 = vmatpush.msra.mxu2 %v2055_v49  ;;  %v569_v49 = vld [vmem:[%s3605_s7 + $0x18] sm:$0xff]  ;;  %v568_v40 = vld [vmem:[%s3605_s7 + $0x10] sm:$0xff] }
 0x29d   :  { %588 = vmatpush.msrb.mxu0 %v569_v49  ;;  %v2220_v49 = vmov 16.0  }
 0x29e   :  { %416 = vmax.xlane.f32.xlu0 %v411_v41  ;;  %493 = vmatpush.msra.mxu2 %v2056_v46  ;;  %v566_v46 = vld [vmem:[%s3605_s7] sm:$0xff] }
 0x29f   :  { %589 = vmatpush.msrb.mxu0 %v568_v40 }
 0x2a0   :  { %494 = vmatpush.msra.mxu2 %v2060_v47 }
 0x2a1   :  { %v2074_v52 = vpop.permute.xlu2 %2073 }
 0x2a2   :  { %495 = vmatpush.msra.mxu2 %v2061_v51  ;;  %v2075_v9 = vunpack.i.l.bf16 %v2074_v52  ;;  %v2076_v26 = vunpack.i.h.bf16 %v2074_v52 }
 0x2a3   :  { %v413_v63 = vpop.f32.mrf.mxu1 }
 0x2a4   :  { %v414_v3 = vadd.f32 %v413_v63, %v112_v58  ;;  %496 = vmatpush.msra.mxu2 %v2065_v59 }
 0x2a6   :  { %418 = vmax.xlane.f32.xlu1 %v414_v3  ;;  %497 = vmatpush.msra.mxu2 %v2066_v5 }
 0x2a8   :  { %498 = vmatpush.msra.mxu2 %v2070_v7 }
 0x2a9   :  { %v2079_v22 = vpop.permute.xlu2 %2078 }
 0x2aa   :  { %499 = vmatpush.msra.mxu2 %v2071_v20  ;;  %v2080_v6 = vunpack.i.l.bf16 %v2079_v22  ;;  %v2081_v14 = vunpack.i.h.bf16 %v2079_v22 }
 0x2ac   :  { %500 = vmatpush.msra.mxu2 %v2075_v9 }
 0x2ae   :  { %501 = vmatpush.msra.mxu2 %v2076_v26 }
 0x2b0   :  { %502 = vmatpush.msra.mxu2 %v2080_v6 }
 0x2b1   :  { %v2084_v28 = vpop.permute.xlu2 %2083 }
 0x2b2   :  { %503 = vmatpush.msra.mxu2 %v2081_v14  ;;  %v2085_v19 = vunpack.i.l.bf16 %v2084_v28  ;;  %v2086_v30 = vunpack.i.h.bf16 %v2084_v28 }
 0x2b4   :  { %504 = vmatpush.msra.mxu2 %v2085_v19 }
 0x2b6   :  { %505 = vmatpush.msra.mxu2 %v2086_v30 }
 0x311   :  { %v417_v10 = vpop.xlane.xlu0 %416 }
 0x312   :  { %v420_v13 = vsub.f32 %v411_v41, %v417_v10  ;;  %v567_v41 = vld [vmem:[%s3605_s7 + $0x8] sm:$0xff] }
 0x313   :  { %590 = vmatpush.msrb.mxu0 %v567_v41 }
 0x314   :  { %v422_v32 = vmul.f32 1.442695, %v420_v13 }
 0x315   :  { %591 = vmatpush.msrb.mxu0 %v566_v46 }
 0x316   :  { %2141 = vpow2.f32 %v422_v32 }
 0x319   :  { %v419_v33 = vpop.xlane.xlu1 %418 }
 0x31a   :  { %v421_v17 = vsub.f32 %v414_v3, %v419_v33 }
 0x31c   :  { %v2142_v34 = vpop.eup %2141  ;;  %v424_v29 = vmul.f32 1.442695, %v421_v17 }
 0x31d   :  { %506 = vmatmul.f32.vlgmr.msra.gmra.mxu2 %v2142_v34  ;;  %529 = vmatmul.f32.vlgmr.msra.gmra.mxu3 %v2142_v34 }
 0x31e   :  { %2143 = vpow2.f32 %v424_v29 }
 0x324   :  { %v2144_v38 = vpop.eup %2143 }
 0x325   :  { %509 = vmatmul.f32.gmra.mxu2 %v2144_v38  ;;  %532 = vmatmul.f32.gmra.mxu3 %v2144_v38 }
 0x3a0   :  { %v530_v47 = vpop.f32.mrf.mxu3  ;;  %v507_v22 = vpop.f32.mrf.mxu2 }
 0x3a1   :  { %2145 = vrcp.f32 %v530_v47  ;;  %v547_v63 = vand.u32 2147483648, %v530_v47  ;;  %v545_v5 = vand.u32 2147483647, %v530_v47  ;;  %vm541_vm2 = vweird.f32 %v530_v47 }
 0x3a3   :  { %v548_v9 = vor.u32 1.1754944e-38, %v547_v63  ;;  %vm546_vm4 = vcmp.eq.f32.partialorder %v545_v5, 8.507059e+37 }
 0x3a7   :  { %v2146_v51 = vpop.eup %2145 }
 0x3a8   :  { %v537_v52 = vmul.f32 %v2146_v51, %v530_v47  ;;  %v533_v58 = vpop.f32.mrf.mxu3  ;;  %vm542_vm1 = vweird.f32 %v2146_v51  ;;  %v510_v34 = vpop.f32.mrf.mxu2 }
 0x3a9   :  { %2147 = vrcp.f32 %v533_v58  ;;  %vm543_vm3 = vmor %vm541_vm2, %vm542_vm1  ;;  %v562_v30 = vand.u32 2147483648, %v533_v58  ;;  %v560_v13 = vand.u32 2147483647, %v533_v58  ;;  %vm556_vm6 = vweird.f32 %v533_v58 }
 0x3aa   :  { %v538_v59 = vsub.f32 1.0, %v537_v52  ;;  %2149 = vrcp.f32 %v2220_v49 }
 0x3ab   :  { %v563_v33 = vor.u32 1.1754944e-38, %v562_v30  ;;  %vm561_vm8 = vcmp.eq.f32.partialorder %v560_v13, 8.507059e+37 }
 0x3ac   :  { %v539_v3 = vmul.f32 %v2146_v51, %v538_v59 }
 0x3ae   :  { %v540_v7 = vadd.f32 %v2146_v51, %v539_v3 }
 0x3af   :  { %v2148_v20 = vpop.eup %2147 }
 0x3b0   :  { %v552_v26 = vmul.f32 %v2148_v20, %v533_v58  ;;  %v544_v6 = vsel %vm543_vm3, %v2146_v51, %v540_v7  ;;  %vm557_vm5 = vweird.f32 %v2148_v20  ;;  %v2150_v41 = vpop.eup %2149 }
 0x3b1   :  { %v549_v14 = vsel %vm546_vm4, %v548_v9, %v544_v6  ;;  %vm558_vm7 = vmor %vm556_vm6, %vm557_vm5  ;;  %v613_v47 = vmul.f32 16.0, %v2150_v41  ;;  %vm617_vm9 = vweird.f32 %v2150_v41 }
 0x3b2   :  { %v553_v28 = vsub.f32 1.0, %v552_v26  ;;  %v550_v19 = vmul.f32 %v549_v14, %v507_v22 }
 0x3b3   :  { %v614_v63 = vsub.f32 1.0, %v613_v47 }
 0x3b4   :  { %v554_v10 = vmul.f32 %v2148_v20, %v553_v28  ;;  %1895 = vmatmul.msk.f32.vlgmr.msrb.gmra.mxu0 %vm133_vm0, %v550_v19 }
 0x3b5   :  { %v615_v7 = vmul.f32 %v2150_v41, %v614_v63  ;;  %v653_v63 = vld [vmem:[%s3608_s10] sm:$0xff] }
 0x3b6   :  { %v555_v32 = vadd.f32 %v2148_v20, %v554_v10 }
 0x3b7   :  { %v616_v9 = vadd.f32 %v2150_v41, %v615_v7 }
 0x3b8   :  { %v559_v17 = vsel %vm558_vm7, %v2148_v20, %v555_v32 }
 0x3b9   :  { %v564_v29 = vsel %vm561_vm8, %v563_v33, %v559_v17  ;;  %v2737_v14 = vsel %vm617_vm9, %v2150_v41, %v616_v9  ;;  %v662_v41 = vld [vmem:[%s3608_s10 + $0x48] sm:$0xff] }
 0x3ba   :  { %v565_v38 = vmul.f32 %v564_v29, %v510_v34  ;;  %v665_v34 = vld [vmem:[%s3608_s10 + $0x60] sm:$0xff]  ;;  %v666_v29 = vld [vmem:[%s3608_s10 + $0x68] sm:$0xff] }
 0x3bb   :  { %697 = vmatpush.msra.mxu0 %v665_v34  ;;  %720 = vmatpush.msrb.mxu2 %v666_v29  ;;  %v2128_v34 = vld [vmem:[%s3606_s8] ss:$0 sm:$0xff]  ;;  %v800_v29 = vld [vmem:[%s3610_s12 + $0x78] sm:$0xff] }
 0x3bc   :  { %1896 = vmatmul.msk.f32.gmra.mxu0 %vm133_vm0, %v565_v38  ;;  %v667_v38 = vld [vmem:[%s3608_s10 + $0x70] sm:$0xff] }
 0x3bd   :  { %743 = vmatpush.msrb.mxu3 %v667_v38  ;;  %721 = vmatpush.msrb.mxu2 %v662_v41  ;;  %v799_v38 = vld [vmem:[%s3610_s12 + $0x70] sm:$0xff] }
 0x431   :  { %v593_v40 = vpop.f32.mrf.mxu0 }
 0x432   :  { %v599_v46 = vadd.f32 %v593_v40, %v2460_v36  ;;  %v661_v40 = vld [vmem:[%s3608_s10 + $0x40] sm:$0xff] }
 0x433   :  { %698 = vmatpush.msra.mxu0 %v661_v40  ;;  %v816_v40 = vld [vmem:[%s3610_s12 + $0xf8] sm:$0xff] }
 0x434   :  { %v603_v58 = vsel %vm133_vm0, %v599_v46, 0.0 }
 0x439   :  { %v596_v51 = vpop.f32.mrf.mxu0 }
 0x43a   :  { %v600_v52 = vadd.f32 %v596_v51, %v2469_v39  ;;  %v657_v51 = vld [vmem:[%s3608_s10 + $0x20] sm:$0xff] }
 0x43b   :  { %699 = vmatpush.msra.mxu0 %v657_v51  ;;  %v815_v51 = vld [vmem:[%s3610_s12 + $0xf0] sm:$0xff] }
 0x43c   :  { %v604_v59 = vsel %vm133_vm0, %v600_v52, 0.0 }
 0x43d   :  { %v605_v3 = vadd.f32 %v604_v59, %v603_v58  ;;  %v659_v58 = vld [vmem:[%s3608_s10 + $0x30] sm:$0xff]  ;;  %700 = vmatpush.msra.mxu0 %v653_v63 }
 0x43f   :  { %v606_v5 = vrot.slane %v605_v3, 4 }
 0x441   :  { %v607_v20 = vadd.f32 %v606_v5, %v605_v3  ;;  %v654_v3 = vld [vmem:[%s3608_s10 + $0x8] sm:$0xff]  ;;  %v655_v5 = vld [vmem:[%s3608_s10 + $0x10] sm:$0xff] }
 0x443   :  { %v608_v22 = vrot.slane %v607_v20, 2 }
 0x445   :  { %v609_v26 = vadd.f32 %v608_v22, %v607_v20  ;;  %v668_v20 = vld [vmem:[%s3608_s10 + $0x78] sm:$0xff] }
 0x446   :  { %v664_v22 = vld [vmem:[%s3608_s10 + $0x58] sm:$0xff]  ;;  %766 = vmatpush.msrb.mxu0 %v668_v20 }
 0x447   :  { %v610_v6 = vrot.slane %v609_v26, 1  ;;  %v848_v20 = vld [vmem:[%s3610_s12 + $0x1f8] sm:$0xff] }
 0x448   :  { %767 = vmatpush.msrb.mxu0 %v664_v22  ;;  %v795_v22 = vld [vmem:[%s3610_s12 + $0x50] sm:$0xff]  ;;  %920 = vmatpush.msrb.mxu1 %v848_v20  ;;  %v806_v20 = vld [vmem:[%s3610_s12 + $0xa8] sm:$0xff] }
 0x449   :  { %v611_v36 = vadd.f32 %v610_v6, %v609_v26 }
 0x44b   :  { %v619_v28 = vmul.f32 %v2737_v14, %v611_v36  ;;  %v660_v36 = vld [vmem:[%s3608_s10 + $0x38] sm:$0xff] }
 0x44c   :  { %768 = vmatpush.msrb.mxu0 %v660_v36  ;;  %v847_v36 = vld [vmem:[%s3610_s12 + $0x1f0] sm:$0xff] }
 0x44d   :  { %v2740_v39 = vsub.f32 %v599_v46, %v619_v28  ;;  %v2742_v19 = vsub.f32 %v600_v52, %v619_v28  ;;  %v663_v46 = vld [vmem:[%s3608_s10 + $0x50] sm:$0xff]  ;;  %v658_v52 = vld [vmem:[%s3608_s10 + $0x28] sm:$0xff]  ;;  %v656_v28 = vld [vmem:[%s3608_s10 + $0x18] sm:$0xff]  ;;  %921 = vmatpush.msrb.mxu1 %v847_v36 }
 0x44e   :  { %744 = vmatpush.msrb.mxu3 %v663_v46  ;;  %722 = vmatpush.msrb.mxu2 %v658_v52  ;;  %v2129_v46 = vld [vmem:[%s3607_s9] ss:$0 sm:$0xff]  ;;  %v814_v52 = vld [vmem:[%s3610_s12 + $0xe8] sm:$0xff] }
 0x44f   :  { %v622_v30 = vmul.f32 %v2740_v39, %v2740_v39  ;;  %v623_v10 = vmul.f32 %v2742_v19, %v2742_v19  ;;  %769 = vmatpush.msrb.mxu0 %v656_v28  ;;  %v794_v28 = vld [vmem:[%s3610_s12 + $0x48] sm:$0xff]  ;;  %v821_v36 = vld [vmem:[%s3610_s12 + $0x120] sm:$0xff] }
 0x450   :  { %745 = vmatpush.msrb.mxu3 %v659_v58  ;;  %723 = vmatpush.msrb.mxu2 %v654_v3  ;;  %v832_v3 = vld [vmem:[%s3610_s12 + $0x178] sm:$0xff] }
 0x451   :  { %v624_v13 = vsel %vm133_vm0, %v622_v30, 0.0  ;;  %v625_v32 = vsel %vm133_vm0, %v623_v10, 0.0 }
 0x452   :  { %v626_v33 = vadd.f32 %v625_v32, %v624_v13  ;;  %746 = vmatpush.msrb.mxu3 %v655_v5  ;;  %851 = vmatpush.msra.mxu2 %v800_v29  ;;  %v796_v5 = vld [vmem:[%s3610_s12 + $0x58] sm:$0xff] }
 0x453   :  { %v792_v29 = vld [vmem:[%s3610_s12 + $0x38] sm:$0xff] }
 0x454   :  { %v627_v17 = vrot.slane %v626_v33, 4  ;;  %874 = vmatpush.msra.mxu3 %v816_v40  ;;  %852 = vmatpush.msra.mxu2 %v799_v38  ;;  %v845_v38 = vld [vmem:[%s3610_s12 + $0x1e0] sm:$0xff] }
 0x455   :  { %v809_v40 = vld [vmem:[%s3610_s12 + $0xc0] sm:$0xff] }
 0x456   :  { %v628_v49 = vadd.f32 %v627_v17, %v626_v33  ;;  %875 = vmatpush.msra.mxu3 %v815_v51  ;;  %v808_v51 = vld [vmem:[%s3610_s12 + $0xb8] sm:$0xff] }
 0x458   :  { %v629_v47 = vrot.slane %v628_v49, 2  ;;  %876 = vmatpush.msra.mxu3 %v814_v52  ;;  %v790_v52 = vld [vmem:[%s3610_s12 + $0x28] sm:$0xff] }
 0x45a   :  { %v630_v59 = vadd.f32 %v629_v47, %v628_v49  ;;  %v798_v47 = vld [vmem:[%s3610_s12 + $0x68] sm:$0xff] }
 0x45b   :  { %853 = vmatpush.msra.mxu2 %v798_v47  ;;  %v826_v47 = vld [vmem:[%s3610_s12 + $0x148] sm:$0xff] }
 0x45c   :  { %v631_v7 = vrot.slane %v630_v59, 1 }
 0x45e   :  { %v632_v9 = vadd.f32 %v631_v7, %v630_v59  ;;  %v813_v7 = vld [vmem:[%s3610_s12 + $0xe0] sm:$0xff] }
 0x45f   :  { %877 = vmatpush.msra.mxu3 %v813_v7  ;;  %v823_v7 = vld [vmem:[%s3610_s12 + $0x130] sm:$0xff] }
 0x460   :  { %v633_v26 = vmul.f32 %v632_v9, %v2737_v14  ;;  %v812_v9 = vld [vmem:[%s3610_s12 + $0xd8] sm:$0xff] }
 0x461   :  { %878 = vmatpush.msra.mxu3 %v812_v9  ;;  %v843_v9 = vld [vmem:[%s3610_s12 + $0x1d0] sm:$0xff] }
 0x462   :  { %v634_v6 = vadd.f32 1e-05, %v633_v26 }
 0x464   :  { %2151 = vrsqrt.f32 %v634_v6  ;;  %vm641_vm11 = vweird.f32 %v634_v6 }
 0x46a   :  { %v2152_v30 = vpop.eup %2151 }
 0x46b   :  { %v636_v10 = vmul.f32 %v2152_v30, %v634_v6  ;;  %vm642_vm10 = vweird.f32 %v2152_v30  ;;  %v830_v6 = vld [vmem:[%s3610_s12 + $0x168] sm:$0xff] }
 0x46c   :  { %vm643_vm12 = vmor %vm641_vm11, %vm642_vm10 }
 0x46d   :  { %v637_v13 = vmul.f32 %v2152_v30, %v636_v10  ;;  %v829_v10 = vld [vmem:[%s3610_s12 + $0x160] sm:$0xff] }
 0x46f   :  { %v638_v32 = vmul.f32 0.5, %v637_v13  ;;  %v846_v13 = vld [vmem:[%s3610_s12 + $0x1e8] sm:$0xff] }
 0x470   :  { %922 = vmatpush.msrb.mxu1 %v846_v13  ;;  %v820_v13 = vld [vmem:[%s3610_s12 + $0x118] sm:$0xff] }
 0x471   :  { %v639_v33 = vsub.f32 1.5, %v638_v32 }
 0x472   :  { %923 = vmatpush.msrb.mxu1 %v845_v38  ;;  %v802_v38 = vld [vmem:[%s3610_s12 + $0x88] sm:$0xff] }
 0x473   :  { %v640_v17 = vmul.f32 %v2152_v30, %v639_v33  ;;  %v793_v33 = vld [vmem:[%s3610_s12 + $0x40] sm:$0xff] }
 0x475   :  { %v644_v49 = vsel %vm643_vm12, %v2152_v30, %v640_v17  ;;  %v811_v30 = vld [vmem:[%s3610_s12 + $0xd0] sm:$0xff]  ;;  %v828_v17 = vld [vmem:[%s3610_s12 + $0x158] sm:$0xff] }
 0x476   :  { %v645_v41 = vmul.f32 %v644_v49, %v2740_v39  ;;  %v797_v39 = vld [vmem:[%s3610_s12 + $0x60] sm:$0xff]  ;;  %v646_v59 = vmul.f32 %v644_v49, %v2742_v19  ;;  %v831_v19 = vld [vmem:[%s3610_s12 + $0x170] sm:$0xff]  ;;  %879 = vmatpush.msra.mxu3 %v811_v30 }
 0x477   :  { %854 = vmatpush.msra.mxu2 %v797_v39  ;;  %v827_v49 = vld [vmem:[%s3610_s12 + $0x150] sm:$0xff]  ;;  %v825_v39 = vld [vmem:[%s3610_s12 + $0x140] sm:$0xff] }
 0x478   :  { %v648_v58 = vmul.f32 %v2128_v34, %v645_v41  ;;  %v649_v26 = vmul.f32 %v2128_v34, %v646_v59  ;;  %v810_v34 = vld [vmem:[%s3610_s12 + $0xc8] sm:$0xff]  ;;  %v791_v41 = vld [vmem:[%s3610_s12 + $0x30] sm:$0xff]  ;;  %v789_v59 = vld [vmem:[%s3610_s12 + $0x20] sm:$0xff] }
 0x479   :  { %855 = vmatpush.msra.mxu2 %v796_v5  ;;  %880 = vmatpush.msra.mxu3 %v810_v34  ;;  %v788_v5 = vld [vmem:[%s3610_s12 + $0x18] sm:$0xff]  ;;  %v785_v30 = vld [vmem:[%s3610_s12] sm:$0xff]  ;;  %v819_v34 = vld [vmem:[%s3610_s12 + $0x110] sm:$0xff] }
 0x47a   :  { %v2828_v63 = vadd.f32 %v2129_v46, %v648_v58  ;;  %v2875_v32 = vadd.f32 %v2129_v46, %v649_v26  ;;  %v844_v46 = vld [vmem:[%s3610_s12 + $0x1d8] sm:$0xff]  ;;  %v807_v58 = vld [vmem:[%s3610_s12 + $0xb0] sm:$0xff]  ;;  %v786_v26 = vld [vmem:[%s3610_s12 + $0x8] sm:$0xff] }
 0x47b   :  { %856 = vmatpush.msra.mxu2 %v795_v22  ;;  %881 = vmatpush.msra.mxu3 %v809_v40  ;;  %v822_v22 = vld [vmem:[%s3610_s12 + $0x128] sm:$0xff]  ;;  %v839_v40 = vld [vmem:[%s3610_s12 + $0x1b0] sm:$0xff] }
 0x47c   :  { %1897 = vmatmul.msk.f32.vlgmr.msra.gmra.mxu0 %vm133_vm0, %v2828_v63  ;;  %1899 = vmatmul.msk.f32.vlgmr.msrb.gmra.mxu2 %vm133_vm0, %v2828_v63 }
 0x47d   :  { %1901 = vmatmul.msk.f32.vlgmr.msrb.gmra.mxu3 %vm133_vm0, %v2828_v63  ;;  %897 = vmatpush.msra.mxu0 %v832_v3  ;;  %v824_v3 = vld [vmem:[%s3610_s12 + $0x138] sm:$0xff] }
 0x47e   :  { %857 = vmatpush.msra.mxu2 %v794_v28  ;;  %924 = vmatpush.msrb.mxu1 %v844_v46  ;;  %v842_v28 = vld [vmem:[%s3610_s12 + $0x1c8] sm:$0xff]  ;;  %v817_v46 = vld [vmem:[%s3610_s12 + $0x100] sm:$0xff] }
 0x47f   :  { %898 = vmatpush.msra.mxu0 %v831_v19  ;;  %882 = vmatpush.msra.mxu3 %v808_v51  ;;  %v787_v19 = vld [vmem:[%s3610_s12 + $0x10] sm:$0xff]  ;;  %v837_v51 = vld [vmem:[%s3610_s12 + $0x1a0] sm:$0xff] }
 0x480   :  { %858 = vmatpush.msra.mxu2 %v793_v33  ;;  %925 = vmatpush.msrb.mxu1 %v843_v9  ;;  %v841_v33 = vld [vmem:[%s3610_s12 + $0x1c0] sm:$0xff]  ;;  %v2175_v9 = vld [vmem:[%s3635_s26 + $0x58] sm:$0xff] }
 0x481   :  { %899 = vmatpush.msra.mxu0 %v830_v6  ;;  %883 = vmatpush.msra.mxu3 %v807_v58  ;;  %v805_v6 = vld [vmem:[%s3610_s12 + $0xa0] sm:$0xff]  ;;  %v835_v58 = vld [vmem:[%s3610_s12 + $0x190] sm:$0xff] }
 0x482   :  { %859 = vmatpush.msra.mxu2 %v792_v29  ;;  %926 = vmatpush.msrb.mxu1 %v842_v28  ;;  %v840_v29 = vld [vmem:[%s3610_s12 + $0x1b8] sm:$0xff] }
 0x483   :  { %900 = vmatpush.msra.mxu0 %v829_v10  ;;  %884 = vmatpush.msra.mxu3 %v806_v20  ;;  %v804_v10 = vld [vmem:[%s3610_s12 + $0x98] sm:$0xff] }
 0x484   :  { %1898 = vmatmul.msk.f32.gmra.mxu0 %vm133_vm0, %v2875_v32  ;;  %1900 = vmatmul.msk.f32.gmra.mxu2 %vm133_vm0, %v2875_v32 }
 0x485   :  { %1902 = vmatmul.msk.f32.gmra.mxu3 %vm133_vm0, %v2875_v32  ;;  %901 = vmatpush.msra.mxu0 %v828_v17  ;;  %v803_v17 = vld [vmem:[%s3610_s12 + $0x90] sm:$0xff] }
 0x486   :  { %860 = vmatpush.msra.mxu2 %v791_v41  ;;  %885 = vmatpush.msra.mxu3 %v805_v6  ;;  %v801_v41 = vld [vmem:[%s3610_s12 + $0x80] sm:$0xff] }
 0x487   :  { %902 = vmatpush.msra.mxu0 %v827_v49  ;;  %927 = vmatpush.msrb.mxu1 %v841_v33  ;;  %v818_v49 = vld [vmem:[%s3610_s12 + $0x108] sm:$0xff]  ;;  %v2178_v33 = vld [vmem:[%s3635_s26 + $0x40] sm:$0xff] }
 0x488   :  { %861 = vmatpush.msra.mxu2 %v790_v52  ;;  %886 = vmatpush.msra.mxu3 %v804_v10  ;;  %v836_v52 = vld [vmem:[%s3610_s12 + $0x198] sm:$0xff]  ;;  %v2177_v10 = vld [vmem:[%s3635_s26 + $0x48] sm:$0xff] }
 0x489   :  { %903 = vmatpush.msra.mxu0 %v826_v47  ;;  %928 = vmatpush.msrb.mxu1 %v840_v29  ;;  %v838_v47 = vld [vmem:[%s3610_s12 + $0x1a8] sm:$0xff] }
 0x48a   :  { %862 = vmatpush.msra.mxu2 %v789_v59  ;;  %887 = vmatpush.msra.mxu3 %v803_v17  ;;  %v833_v59 = vld [vmem:[%s3610_s12 + $0x180] sm:$0xff] }
 0x48b   :  { %904 = vmatpush.msra.mxu0 %v825_v39  ;;  %929 = vmatpush.msrb.mxu1 %v839_v40  ;;  %v834_v39 = vld [vmem:[%s3610_s12 + $0x188] sm:$0xff] }
 0x48c   :  { %1903 = vmatmul.msk.f32.vlgmr.msrb.gmra.mxu0 %vm133_vm0, %v2828_v63  ;;  %863 = vmatpush.msra.mxu2 %v788_v5  ;;  %v2172_v5 = vld [vmem:[%s3635_s26 + $0x70] sm:$0xff] }
 0x48d   :  { %905 = vmatpush.msra.mxu0 %v824_v3  ;;  %888 = vmatpush.msra.mxu3 %v802_v38  ;;  %v2171_v3 = vld [vmem:[%s3635_s26 + $0x78] sm:$0xff] }
 0x48e   :  { %864 = vmatpush.msra.mxu2 %v787_v19  ;;  %930 = vmatpush.msrb.mxu1 %v838_v47  ;;  %v2173_v19 = vld [vmem:[%s3635_s26 + $0x68] sm:$0xff]  ;;  %v2179_v38 = vld [vmem:[%s3635_s26 + $0x38] sm:$0xff]  ;;  %v2180_v47 = vld [vmem:[%s3635_s26 + $0x30] sm:$0xff] }
 0x48f   :  { %906 = vmatpush.msra.mxu0 %v823_v7  ;;  %889 = vmatpush.msra.mxu3 %v801_v41  ;;  %v3028_v7 = vld [vmem:[%s3609_s11] ss:$2 sm:$0xf] }
 0x490   :  { %865 = vmatpush.msra.mxu2 %v786_v26  ;;  %931 = vmatpush.msrb.mxu1 %v837_v51  ;;  %v671_v20 = vperm.slane %v3028_v7, 0 }
 0x491   :  { %907 = vmatpush.msra.mxu0 %v822_v22  ;;  %v2174_v22 = vld [vmem:[%s3635_s26 + $0x60] sm:$0xff] }
 0x492   :  { %866 = vmatpush.msra.mxu2 %v785_v30  ;;  %932 = vmatpush.msrb.mxu1 %v836_v52  ;;  %v672_v30 = vperm.slane %v3028_v7, 1 }
 0x493   :  { %908 = vmatpush.msra.mxu0 %v821_v36  ;;  %v2176_v36 = vld [vmem:[%s3635_s26 + $0x50] sm:$0xff] }
 0x494   :  { %1904 = vmatmul.msk.f32.gmra.mxu0 %vm133_vm0, %v2875_v32  ;;  %933 = vmatpush.msrb.mxu1 %v835_v58  ;;  %v2181_v58 = vld [vmem:[%s3635_s26 + $0x28] sm:$0xff] }
 0x495   :  { %909 = vmatpush.msra.mxu0 %v820_v13  ;;  %v673_v13 = vperm.slane %v3028_v7, 2 }
 0x496   :  { %934 = vmatpush.msrb.mxu1 %v834_v39  ;;  %v674_v39 = vperm.slane %v3028_v7, 3  ;;  %v2184_v7 = vld [vmem:[%s3635_s26 + $0x10] sm:$0xff] }
 0x497   :  { %910 = vmatpush.msra.mxu0 %v819_v34 }
 0x498   :  { %935 = vmatpush.msrb.mxu1 %v833_v59  ;;  %v2182_v59 = vld [vmem:[%s3635_s26 + $0x20] sm:$0xff] }
 0x499   :  { %911 = vmatpush.msra.mxu0 %v818_v49 }
 0x49a   :  { %1262 = vmatpush.msra.mxu1 %v2171_v3 }
 0x49b   :  { %912 = vmatpush.msra.mxu0 %v817_v46 }
 0x49c   :  { %1263 = vmatpush.msra.mxu1 %v2172_v5 }
 0x49e   :  { %1264 = vmatpush.msra.mxu1 %v2173_v19 }
 0x4a0   :  { %1265 = vmatpush.msra.mxu1 %v2174_v22 }
 0x4a2   :  { %1266 = vmatpush.msra.mxu1 %v2175_v9 }
 0x4a4   :  { %1267 = vmatpush.msra.mxu1 %v2176_v36 }
 0x4a6   :  { %1268 = vmatpush.msra.mxu1 %v2177_v10  ;;  %v2186_v10 = vld [vmem:[%s3635_s26] sm:$0xff] }
 0x4a8   :  { %1269 = vmatpush.msra.mxu1 %v2178_v33 }
 0x4aa   :  { %1270 = vmatpush.msra.mxu1 %v2179_v38 }
 0x4ac   :  { %1271 = vmatpush.msra.mxu1 %v2180_v47 }
 0x4ae   :  { %1272 = vmatpush.msra.mxu1 %v2181_v58 }
 0x4b0   :  { %1273 = vmatpush.msra.mxu1 %v2182_v59 }
 0x4f9   :  { %v702_v26 = vpop.f32.mrf.mxu0 }
 0x4fa   :  { %v703_v6 = vadd.f32 %v702_v26, %v671_v20 }
 0x4fc   :  { %v777_v28 = vmax.f32 %v703_v6, 0.0 }
 0x4fe   :  { %867 = vmatmul.f32.vlgmr.msra.gmra.mxu2 %v777_v28 }
 0x4ff   :  { %v725_v17 = vpop.f32.mrf.mxu2 }
 0x500   :  { %v726_v34 = vadd.f32 %v725_v17, %v672_v30  ;;  %v748_v29 = vpop.f32.mrf.mxu3 }
 0x501   :  { %v749_v49 = vadd.f32 %v748_v29, %v673_v13  ;;  %v705_v40 = vpop.f32.mrf.mxu0  ;;  %v2130_v29 = vld [vmem:[%s3611_s13] ss:$0 sm:$0xff] }
 0x502   :  { %v778_v41 = vmax.f32 %v726_v34, 0.0  ;;  %v706_v46 = vadd.f32 %v705_v40, %v671_v20  ;;  %v2183_v20 = vld [vmem:[%s3635_s26 + $0x18] sm:$0xff] }
 0x503   :  { %v779_v51 = vmax.f32 %v749_v49, 0.0  ;;  %1274 = vmatpush.msra.mxu1 %v2183_v20 }
 0x504   :  { %v781_v52 = vmax.f32 %v706_v46, 0.0  ;;  %890 = vmatmul.f32.vlgmr.msra.gmra.mxu3 %v778_v41 }
 0x505   :  { %913 = vmatmul.f32.vlgmr.msra.gmra.mxu0 %v779_v51  ;;  %1275 = vmatpush.msra.mxu1 %v2184_v7 }
 0x506   :  { %870 = vmatmul.f32.gmra.mxu2 %v781_v52 }
 0x507   :  { %v728_v3 = vpop.f32.mrf.mxu2 }
 0x508   :  { %v729_v5 = vadd.f32 %v728_v3, %v672_v30  ;;  %v751_v19 = vpop.f32.mrf.mxu3  ;;  %v2185_v30 = vld [vmem:[%s3635_s26 + $0x8] sm:$0xff] }
 0x509   :  { %v752_v22 = vadd.f32 %v751_v19, %v673_v13  ;;  %v771_v9 = vpop.f32.mrf.mxu0  ;;  %1276 = vmatpush.msra.mxu1 %v2185_v30 }
 0x50a   :  { %v782_v26 = vmax.f32 %v729_v5, 0.0  ;;  %v772_v6 = vadd.f32 %v771_v9, %v674_v39 }
 0x50b   :  { %v783_v36 = vmax.f32 %v752_v22, 0.0  ;;  %1277 = vmatpush.msra.mxu1 %v2186_v10 }
 0x50c   :  { %v780_v28 = vmax.f32 %v772_v6, 0.0  ;;  %893 = vmatmul.f32.gmra.mxu3 %v782_v26 }
 0x50d   :  { %916 = vmatmul.f32.gmra.mxu0 %v783_v36 }
 0x50e   :  { %936 = vmatmul.f32.vlgmr.msrb.gmra.mxu1 %v780_v28 }
 0x511   :  { %v774_v13 = vpop.f32.mrf.mxu0 }
 0x512   :  { %v775_v33 = vadd.f32 %v774_v13, %v674_v39 }
 0x514   :  { %v784_v17 = vmax.f32 %v775_v33, 0.0 }
 0x516   :  { %939 = vmatmul.f32.gmra.mxu1 %v784_v17 }
 0x581   :  { %v868_v34 = vpop.f32.mrf.mxu2 }
 0x582   :  { %v869_v38 = vadd.f32 %v2130_v29, %v868_v34  ;;  %v914_v49 = vpop.f32.mrf.mxu0 }
 0x587   :  { %v891_v40 = vpop.f32.mrf.mxu3 }
 0x588   :  { %v892_v41 = vadd.f32 %v891_v40, %v869_v38 }
 0x589   :  { %v871_v46 = vpop.f32.mrf.mxu2 }
 0x58a   :  { %v915_v51 = vadd.f32 %v914_v49, %v892_v41  ;;  %v872_v52 = vadd.f32 %v2130_v29, %v871_v46  ;;  %v917_v5 = vpop.f32.mrf.mxu0  ;;  %v1908_v46 = vld [vmem:[%s3634_s1 + $0x38] sm:$0xff] }
 0x58b   :  { %v937_v47 = vpop.f32.mrf.mxu1  ;;  %1013 = vmatpush.msrb.mxu2 %v1908_v46 }
 0x58c   :  { %v938_v59 = vadd.f32 %v937_v47, %v915_v51  ;;  %v1907_v51 = vld [vmem:[%s3634_s1 + $0x30] sm:$0xff] }
 0x58d   :  { %1014 = vmatpush.msrb.mxu2 %v1907_v51 }
 0x58e   :  { %v943_v20 = vadd.f32 %v938_v59, %v2828_v63  ;;  %v1905_v59 = vld [vmem:[%s3634_s1 + $0x20] sm:$0xff] }
 0x58f   :  { %v894_v58 = vpop.f32.mrf.mxu3 }
 0x590   :  { %v895_v3 = vadd.f32 %v894_v58, %v872_v52  ;;  %v947_v26 = vsel %vm133_vm0, %v943_v20, 0.0  ;;  %v1906_v58 = vld [vmem:[%s3634_s1 + $0x28] sm:$0xff] }
 0x591   :  { %1015 = vmatpush.msrb.mxu2 %v1906_v58 }
 0x592   :  { %v918_v39 = vadd.f32 %v917_v5, %v895_v3 }
 0x593   :  { %v940_v19 = vpop.f32.mrf.mxu1  ;;  %1016 = vmatpush.msrb.mxu2 %v1905_v59 }
 0x594   :  { %v941_v22 = vadd.f32 %v940_v19, %v918_v39 }
 0x596   :  { %v944_v9 = vadd.f32 %v941_v22, %v2875_v32 }
 0x598   :  { %v948_v6 = vsel %vm133_vm0, %v944_v9, 0.0 }
 0x599   :  { %v949_v7 = vadd.f32 %v948_v6, %v947_v26 }
 0x59b   :  { %v950_v36 = vrot.slane %v949_v7, 4 }
 0x59d   :  { %v951_v28 = vadd.f32 %v950_v36, %v949_v7 }
 0x59f   :  { %v952_v30 = vrot.slane %v951_v28, 2 }
 0x5a1   :  { %v953_v10 = vadd.f32 %v952_v30, %v951_v28  ;;  %v2131_v28 = vld [vmem:[%s3612_s14] ss:$0 sm:$0xff] }
 0x5a3   :  { %v954_v13 = vrot.slane %v953_v10, 1 }
 0x5a5   :  { %v955_v33 = vadd.f32 %v954_v13, %v953_v10  ;;  %v2132_v13 = vld [vmem:[%s3613_s15] ss:$0 sm:$0xff] }
 0x5a7   :  { %v956_v17 = vmul.f32 %v955_v33, %v2737_v14 }
 0x5a9   :  { %v957_v34 = vsub.f32 %v943_v20, %v956_v17  ;;  %v958_v29 = vsub.f32 %v944_v9, %v956_v17 }
 0x5ab   :  { %v959_v38 = vmul.f32 %v957_v34, %v957_v34  ;;  %v960_v63 = vmul.f32 %v958_v29, %v958_v29 }
 0x5ad   :  { %v961_v49 = vsel %vm133_vm0, %v959_v38, 0.0  ;;  %v962_v32 = vsel %vm133_vm0, %v960_v63, 0.0 }
 0x5ae   :  { %v963_v40 = vadd.f32 %v962_v32, %v961_v49 }
 0x5b0   :  { %v964_v41 = vrot.slane %v963_v40, 4 }
 0x5b2   :  { %v965_v47 = vadd.f32 %v964_v41, %v963_v40 }
 0x5b4   :  { %v966_v52 = vrot.slane %v965_v47, 2 }
 0x5b6   :  { %v967_v3 = vadd.f32 %v966_v52, %v965_v47 }
 0x5b8   :  { %v968_v5 = vrot.slane %v967_v3, 1 }
 0x5ba   :  { %v969_v39 = vadd.f32 %v968_v5, %v967_v3 }
 0x5bc   :  { %v970_v19 = vmul.f32 %v969_v39, %v2737_v14 }
 0x5be   :  { %v971_v20 = vadd.f32 1e-05, %v970_v19 }
 0x5c0   :  { %2153 = vrsqrt.f32 %v971_v20  ;;  %vm978_vm14 = vweird.f32 %v971_v20 }
 0x5c6   :  { %v2154_v22 = vpop.eup %2153 }
 0x5c7   :  { %v973_v9 = vmul.f32 %v2154_v22, %v971_v20  ;;  %vm979_vm13 = vweird.f32 %v2154_v22 }
 0x5c8   :  { %vm980_vm15 = vmor %vm978_vm14, %vm979_vm13 }
 0x5c9   :  { %v974_v26 = vmul.f32 %v2154_v22, %v973_v9 }
 0x5cb   :  { %v975_v6 = vmul.f32 0.5, %v974_v26 }
 0x5cd   :  { %v976_v7 = vsub.f32 1.5, %v975_v6 }
 0x5cf   :  { %v977_v36 = vmul.f32 %v2154_v22, %v976_v7 }
 0x5d1   :  { %v981_v30 = vsel %vm980_vm15, %v2154_v22, %v977_v36 }
 0x5d2   :  { %v982_v10 = vmul.f32 %v981_v30, %v957_v34  ;;  %v983_v17 = vmul.f32 %v981_v30, %v958_v29 }
 0x5d4   :  { %v985_v33 = vmul.f32 %v2131_v28, %v982_v10  ;;  %v986_v63 = vmul.f32 %v2131_v28, %v983_v17 }
 0x5d6   :  { %v3105_v38 = vadd.f32 %v2132_v13, %v985_v33  ;;  %v3109_v49 = vadd.f32 %v2132_v13, %v986_v63 }
 0x5d8   :  { %1909 = vmatmul.msk.f32.vlgmr.msrb.gmra.mxu2 %vm133_vm0, %v3105_v38 }
 0x5e0   :  { %1910 = vmatmul.msk.f32.gmra.mxu2 %vm133_vm0, %v3109_v49 }
 0x65b   :  { %v3113_v32 = vpop.f32.mrf.mxu2 }
 0x65c   :  { %v1038_v34 = vmul.f32 %v3113_v32, %v2499_v45  ;;  %v1036_v29 = vmul.f32 %v3113_v32, %v2510_v50  ;;  %v1034_v45 = vmul.f32 %v3113_v32, %v2531_v56  ;;  %v1028_v56 = vmul.f32 %v3113_v32, %v2556_v1 }
 0x65d   :  { %v1024_v51 = vmul.f32 %v3113_v32, %v2601_v27 }
 0x65e   :  { %1100 = vrot.lane.b32.xlu2 %v1038_v34, %s2218_s24 }
 0x663   :  { %v3118_v40 = vpop.f32.mrf.mxu2 }
 0x664   :  { %v1039_v41 = vmul.f32 %v3118_v40, %v2491_v43  ;;  %v1037_v46 = vmul.f32 %v3118_v40, %v2506_v48  ;;  %v1035_v47 = vmul.f32 %v3118_v40, %v2520_v53  ;;  %v1031_v50 = vmul.f32 %v3118_v40, %v2544_v61 }
 0x665   :  { %v1032_v43 = vmul.f32 %v3113_v32, %v2553_v0  ;;  %v1033_v48 = vmul.f32 %v3118_v40, %v2524_v55  ;;  %v1030_v53 = vmul.f32 %v3113_v32, %v2542_v60  ;;  %v1029_v61 = vmul.f32 %v3118_v40, %v2564_v4 }
 0x666   :  { %1096 = vrot.lane.b32.xlu2 %v1036_v29, %s2218_s24  ;;  %1102 = vrot.lane.b32.xlu0 %v1039_v41, %s2218_s24  ;;  %v1025_v0 = vmul.f32 %v3118_v40, %v2569_v8  ;;  %v1026_v55 = vmul.f32 %v3113_v32, %v2576_v21  ;;  %v1027_v1 = vmul.f32 %v3118_v40, %v2585_v24 }
 0x667   :  { %1098 = vrot.lane.b32.xlu1 %v1037_v46, %s2218_s24  ;;  %v1055_v60 = vmul.f32 %v3118_v40, %v2635_v31  ;;  %v1054_v4 = vmul.f32 %v3113_v32, %v2633_v23  ;;  %v1051_v21 = vmul.f32 %v3118_v40, %v2656_v42  ;;  %v1053_v24 = vmul.f32 %v3118_v40, %v2650_v37 }
 0x668   :  { %v1050_v31 = vmul.f32 %v3113_v32, %v2661_v44  ;;  %v1052_v23 = vmul.f32 %v3113_v32, %v2648_v35  ;;  %v1049_v27 = vmul.f32 %v3118_v40, %v2667_v54  ;;  %v1048_v42 = vmul.f32 %v3113_v32, %v2670_v57 }
 0x669   :  { %v2087_v8 = vpack.i.bf16 %v1054_v4, %v1055_v60  ;;  %v1047_v37 = vmul.f32 %v3118_v40, %v2676_v62  ;;  %v1046_v35 = vmul.f32 %v3113_v32, %v2679_v2  ;;  %v1045_v3 = vmul.f32 %v3118_v40, %v2685_v15 }
 0x66a   :  { %v2097_v52 = vpack.i.bf16 %v1050_v31, %v1051_v21  ;;  %v2092_v58 = vpack.i.bf16 %v1052_v23, %v1053_v24  ;;  %v2102_v59 = vpack.i.bf16 %v1048_v42, %v1049_v27  ;;  %v1044_v54 = vmul.f32 %v3113_v32, %v2687_v16  ;;  %v2188_v31 = vld [vmem:[%s3639_s27 + $0x8] sm:$0xff] }
 0x66b   :  { %v2107_v44 = vpack.i.bf16 %v1046_v35, %v1047_v37  ;;  %v1043_v57 = vmul.f32 %v3118_v40, %v2694_v25  ;;  %v1042_v62 = vmul.f32 %v3113_v32, %v2697_v11 }
 0x66c   :  { %v2112_v5 = vpack.i.bf16 %v1044_v54, %v1045_v3 }
 0x66d   :  { %v2117_v39 = vpack.i.bf16 %v1042_v62, %v1043_v57  ;;  %v1930_v62 = vld [vmem:[%s3605_s7 + $0x28] sm:$0xff] }
 0x66e   :  { %1092 = vrot.lane.b32.xlu2 %v1034_v45, %s2218_s24  ;;  %1094 = vrot.lane.b32.xlu0 %v1035_v47, %s2218_s24 }
 0x66f   :  { %1086 = vrot.lane.b32.xlu1 %v1031_v50, %s2218_s24 }
 0x676   :  { %1088 = vrot.lane.b32.xlu2 %v1032_v43, %s2218_s24  ;;  %1090 = vrot.lane.b32.xlu0 %v1033_v48, %s2218_s24 }
 0x677   :  { %1080 = vrot.lane.b32.xlu1 %v1028_v56, %s2218_s24 }
 0x67e   :  { %1084 = vrot.lane.b32.xlu0 %v1030_v53, %s2218_s24  ;;  %1082 = vrot.lane.b32.xlu2 %v1029_v61, %s2218_s24 }
 0x67f   :  { %1074 = vrot.lane.b32.xlu1 %v1025_v0, %s2218_s24 }
 0x686   :  { %1076 = vrot.lane.b32.xlu2 %v1026_v55, %s2218_s24  ;;  %1078 = vrot.lane.b32.xlu0 %v1027_v1, %s2218_s24 }
 0x68e   :  { %2088 = vrot.lane.b32.xlu2 %v2087_v8, %s2219_s2  ;;  %1072 = vrot.lane.b32.xlu0 %v1024_v51, %s2218_s24  ;;  %v2187_v51 = vld [vmem:[%s3639_s27] sm:$0xff] }
 0x696   :  { %2098 = vrot.lane.b32.xlu2 %v2097_v52, %s2219_s2  ;;  %2093 = vrot.lane.b32.xlu0 %v2092_v58, %s2219_s2  ;;  %v1041_v52 = vmul.f32 %v3118_v40, %v2703_v12  ;;  %v1040_v58 = vmul.f32 %v3113_v32, %v2706_v18  ;;  %v1932_v18 = vld [vmem:[%s3605_s7 + $0x38] sm:$0xff] }
 0x697   :  { %1338 = vmatpush.msra.mxu2 %v1932_v18 }
 0x698   :  { %v2122_v27 = vpack.i.bf16 %v1040_v58, %v1041_v52 }
 0x69e   :  { %2103 = vrot.lane.b32.xlu2 %v2102_v59, %s2219_s2 }
 0x6a6   :  { %2108 = vrot.lane.b32.xlu2 %v2107_v44, %s2219_s2 }
 0x6ae   :  { %2113 = vrot.lane.b32.xlu2 %v2112_v5, %s2219_s2 }
 0x6b6   :  { %2118 = vrot.lane.b32.xlu2 %v2117_v39, %s2219_s2  ;;  %v1929_v39 = vld [vmem:[%s3605_s7 + $0x20] sm:$0xff] }
 0x6b8   :  { %v1101_v2 = vpop.permute.xlu2 %1100 }
 0x6c0   :  { %v1097_v19 = vpop.permute.xlu2 %1096 }
 0x6c8   :  { %v1093_v20 = vpop.permute.xlu2 %1092 }
 0x6d0   :  { %v1089_v22 = vpop.permute.xlu2 %1088 }
 0x6d8   :  { %v1103_v15 = vpop.permute.xlu0 %1102  ;;  %v1083_v9 = vpop.permute.xlu2 %1082 }
 0x6d9   :  { %1911 = vmatpush.xpose.msk.msrb.mxu3 %vm133_vm0, %v1103_v15  ;;  %v1099_v16 = vpop.permute.xlu1 %1098 }
 0x6dd   :  { %1912 = vmatpush.xpose.msk.msrb.mxu3 %vm133_vm0, %v1101_v2 }
 0x6e0   :  { %v1095_v26 = vpop.permute.xlu0 %1094  ;;  %v1077_v6 = vpop.permute.xlu2 %1076 }
 0x6e1   :  { %1913 = vmatpush.xpose.msk.msrb.mxu3 %vm133_vm0, %v1099_v16  ;;  %v1087_v10 = vpop.permute.xlu1 %1086 }
 0x6e5   :  { %1914 = vmatpush.xpose.msk.msrb.mxu3 %vm133_vm0, %v1097_v19 }
 0x6e8   :  { %v1091_v25 = vpop.permute.xlu0 %1090  ;;  %v2089_v11 = vpop.permute.xlu2 %2088 }
 0x6e9   :  { %v2090_v7 = vunpack.i.l.bf16 %v2089_v11  ;;  %1915 = vmatpush.xpose.msk.msrb.mxu3 %vm133_vm0, %v1095_v26  ;;  %v2091_v36 = vunpack.i.h.bf16 %v2089_v11  ;;  %v1081_v63 = vpop.permute.xlu1 %1080 }
 0x6eb   :  { %1239 = vmatpush.msrb.mxu0 %v2090_v7 }
 0x6ed   :  { %1916 = vmatpush.xpose.msk.msrb.mxu3 %vm133_vm0, %v1093_v20  ;;  %1240 = vmatpush.msrb.mxu0 %v2091_v36 }
 0x6f0   :  { %v1085_v28 = vpop.permute.xlu0 %1084  ;;  %v2099_v30 = vpop.permute.xlu2 %2098 }
 0x6f1   :  { %1917 = vmatpush.xpose.msk.msrb.mxu3 %vm133_vm0, %v1091_v25  ;;  %v2100_v45 = vunpack.i.l.bf16 %v2099_v30  ;;  %v2101_v47 = vunpack.i.h.bf16 %v2099_v30  ;;  %v1075_v50 = vpop.permute.xlu1 %1074 }
 0x6f5   :  { %1918 = vmatpush.xpose.msk.msrb.mxu3 %vm133_vm0, %v1089_v22 }
 0x6f8   :  { %v1079_v13 = vpop.permute.xlu0 %1078  ;;  %v2104_v33 = vpop.permute.xlu2 %2103 }
 0x6f9   :  { %1919 = vmatpush.xpose.msk.msrb.mxu3 %vm133_vm0, %v1087_v10  ;;  %v2105_v48 = vunpack.i.l.bf16 %v2104_v33  ;;  %v2106_v56 = vunpack.i.h.bf16 %v2104_v33 }
 0x6fd   :  { %1920 = vmatpush.xpose.msk.msrb.mxu3 %vm133_vm0, %v1085_v28 }
 0x700   :  { %v1073_v17 = vpop.permute.xlu0 %1072  ;;  %v2109_v34 = vpop.permute.xlu2 %2108 }
 0x701   :  { %1921 = vmatpush.xpose.msk.msrb.mxu3 %vm133_vm0, %v1083_v9  ;;  %v2110_v53 = vunpack.i.l.bf16 %v2109_v34  ;;  %v2111_v61 = vunpack.i.h.bf16 %v2109_v34 }
 0x705   :  { %1922 = vmatpush.xpose.msk.msrb.mxu3 %vm133_vm0, %v1081_v63 }
 0x708   :  { %v2094_v29 = vpop.permute.xlu0 %2093  ;;  %v2114_v43 = vpop.permute.xlu2 %2113 }
 0x709   :  { %v2095_v41 = vunpack.i.l.bf16 %v2094_v29  ;;  %1923 = vmatpush.xpose.msk.msrb.mxu3 %vm133_vm0, %v1079_v13  ;;  %v2096_v46 = vunpack.i.h.bf16 %v2094_v29  ;;  %v2115_v0 = vunpack.i.l.bf16 %v2114_v43  ;;  %v2116_v1 = vunpack.i.h.bf16 %v2114_v43 }
 0x70b   :  { %1241 = vmatpush.msrb.mxu0 %v2095_v41 }
 0x70d   :  { %1924 = vmatpush.xpose.msk.msrb.mxu3 %vm133_vm0, %v1077_v6  ;;  %1242 = vmatpush.msrb.mxu0 %v2096_v46 }
 0x70f   :  { %1243 = vmatpush.msrb.mxu0 %v2100_v45 }
 0x710   :  { %v2119_v55 = vpop.permute.xlu2 %2118 }
 0x711   :  { %1925 = vmatpush.xpose.msk.msrb.mxu3 %vm133_vm0, %v1075_v50  ;;  %1244 = vmatpush.msrb.mxu0 %v2101_v47  ;;  %v2120_v60 = vunpack.i.l.bf16 %v2119_v55  ;;  %v2121_v4 = vunpack.i.h.bf16 %v2119_v55 }
 0x713   :  { %1245 = vmatpush.msrb.mxu0 %v2105_v48 }
 0x715   :  { %1926 = vmatpush.xpose.msk.msrb.mxu3 %vm133_vm0, %v1073_v17  ;;  %1246 = vmatpush.msrb.mxu0 %v2106_v56 }
 0x717   :  { %1247 = vmatpush.msrb.mxu0 %v2110_v53 }
 0x718   :  { %1927 = vmatmul.msk.f32.vlgmr.msrb.gmra.mxu3 %vm133_vm0, %v3113_v32  ;;  %v1931_v32 = vld [vmem:[%s3605_s7 + $0x30] sm:$0xff] }
 0x719   :  { %1248 = vmatpush.msrb.mxu0 %v2111_v61  ;;  %1339 = vmatpush.msra.mxu2 %v1931_v32  ;;  %v1935_v32 = vld [vmem:[%s3608_s10 + $0x80] sm:$0xff] }
 0x71b   :  { %1249 = vmatpush.msrb.mxu0 %v2115_v0  ;;  %1340 = vmatpush.msra.mxu2 %v1930_v62  ;;  %v1941_v62 = vld [vmem:[%s3608_s10 + $0xb0] sm:$0xff] }
 0x71d   :  { %1250 = vmatpush.msrb.mxu0 %v2116_v1  ;;  %1341 = vmatpush.msra.mxu2 %v1929_v39  ;;  %v1936_v39 = vld [vmem:[%s3608_s10 + $0x88] sm:$0xff] }
 0x71f   :  { %1251 = vmatpush.msrb.mxu0 %v2120_v60 }
 0x720   :  { %1928 = vmatmul.msk.f32.gmra.mxu3 %vm133_vm0, %v3118_v40 }
 0x721   :  { %1252 = vmatpush.msrb.mxu0 %v2121_v4 }
 0x79b   :  { %v1159_v8 = vpop.f32.mrf.mxu3 }
 0x79c   :  { %v1160_v21 = vadd.f32 %v2187_v51, %v1159_v8 }
 0x79e   :  { %1165 = vmax.xlane.f32.xlu1 %v1160_v21 }
 0x7a3   :  { %v1162_v24 = vpop.f32.mrf.mxu3 }
 0x7a4   :  { %v1163_v23 = vadd.f32 %v2188_v31, %v1162_v24 }
 0x7a6   :  { %1167 = vmax.xlane.f32.xlu0 %v1163_v23 }
 0x7b7   :  { %2123 = vrot.lane.b32.xlu1 %v2122_v27, %s2219_s2  ;;  %s1863_s2 = sshll.u32 %s3620_s22, 4  ;;  %s1864_s2 = int_to_ptr.hbm [resolvable:$true] %s1863_s2 }
 0x811   :  { %v1166_v42 = vpop.xlane.xlu1 %1165 }
 0x812   :  { %v1169_v59 = vsub.f32 %v1160_v21, %v1166_v42 }
 0x814   :  { %v1171_v37 = vmul.f32 1.442695, %v1169_v59 }
 0x816   :  { %2155 = vpow2.f32 %v1171_v37  ;;  %v1947_v37 = vld [vmem:[%s3608_s10 + $0xe0] sm:$0xff] }
 0x817   :  { %1442 = vmatpush.msrb.mxu2 %v1947_v37  ;;  %v1967_v37 = vld [vmem:[%s3610_s12 + $0x238] sm:$0xff] }
 0x819   :  { %v1168_v35 = vpop.xlane.xlu0 %1167 }
 0x81a   :  { %v1170_v44 = vsub.f32 %v1163_v23, %v1168_v35  ;;  %v1948_v35 = vld [vmem:[%s3608_s10 + $0xe8] sm:$0xff] }
 0x81c   :  { %v2156_v3 = vpop.eup %2155  ;;  %v1173_v54 = vmul.f32 1.442695, %v1170_v44  ;;  %v1949_v44 = vld [vmem:[%s3608_s10 + $0xf0] sm:$0xff] }
 0x81d   :  { %1278 = vmatmul.f32.vlgmr.msra.gmra.mxu1 %v2156_v3 }
 0x81e   :  { %2157 = vpow2.f32 %v1173_v54  ;;  %v1943_v54 = vld [vmem:[%s3608_s10 + $0xc0] sm:$0xff]  ;;  %1488 = vmatpush.msrb.mxu1 %v1949_v44  ;;  %v1981_v44 = vld [vmem:[%s3610_s12 + $0x2a8] sm:$0xff] }
 0x81f   :  { %1443 = vmatpush.msrb.mxu2 %v1943_v54  ;;  %v1966_v54 = vld [vmem:[%s3610_s12 + $0x230] sm:$0xff] }
 0x824   :  { %v2158_v5 = vpop.eup %2157 }
 0x825   :  { %1281 = vmatmul.f32.gmra.mxu1 %v2158_v5 }
 0x829   :  { %v2124_v57 = vpop.permute.xlu1 %2123 }
 0x82a   :  { %v2125_v12 = vunpack.i.l.bf16 %v2124_v57  ;;  %v2126_v40 = vunpack.i.h.bf16 %v2124_v57  ;;  %v1944_v57 = vld [vmem:[%s3608_s10 + $0xc8] sm:$0xff] }
 0x82c   :  { %1253 = vmatpush.msrb.mxu0 %v2125_v12  ;;  %v1945_v12 = vld [vmem:[%s3608_s10 + $0xd0] sm:$0xff] }
 0x82d   :  { %1489 = vmatpush.msrb.mxu1 %v1945_v12  ;;  %v1979_v12 = vld [vmem:[%s3610_s12 + $0x298] sm:$0xff] }
 0x82e   :  { %1254 = vmatpush.msrb.mxu0 %v2126_v40  ;;  %v1940_v40 = vld [vmem:[%s3608_s10 + $0xa8] sm:$0xff] }
 0x82f   :  { %1255 = vmatmul.f32.vlgmr.msrb.gmra.mxu0 %v2156_v3  ;;  %1490 = vmatpush.msrb.mxu1 %v1941_v62  ;;  %v1965_v62 = vld [vmem:[%s3610_s12 + $0x228] sm:$0xff] }
 0x830   :  { %1465 = vmatpush.msra.mxu0 %v1948_v35  ;;  %v2000_v35 = vld [vmem:[%s3610_s12 + $0x340] sm:$0xff] }
 0x832   :  { %1466 = vmatpush.msra.mxu0 %v1944_v57  ;;  %v1998_v57 = vld [vmem:[%s3610_s12 + $0x330] sm:$0xff] }
 0x834   :  { %1467 = vmatpush.msra.mxu0 %v1940_v40  ;;  %v1997_v40 = vld [vmem:[%s3610_s12 + $0x328] sm:$0xff] }
 0x836   :  { %1468 = vmatpush.msra.mxu0 %v1936_v39  ;;  %v1978_v39 = vld [vmem:[%s3610_s12 + $0x290] sm:$0xff] }
 0x837   :  { %1258 = vmatmul.f32.gmra.mxu0 %v2158_v5  ;;  %v1939_v5 = vld [vmem:[%s3608_s10 + $0xa0] sm:$0xff] }
 0x838   :  { %1444 = vmatpush.msrb.mxu2 %v1939_v5  ;;  %v1980_v5 = vld [vmem:[%s3610_s12 + $0x2a0] sm:$0xff] }
 0x83a   :  { %1445 = vmatpush.msrb.mxu2 %v1935_v32  ;;  %v1995_v32 = vld [vmem:[%s3610_s12 + $0x318] sm:$0xff] }
 0x89a   :  { %v1279_v2 = vpop.f32.mrf.mxu1 }
 0x89b   :  { %2159 = vrcp.f32 %v1279_v2  ;;  %v1296_v9 = vand.u32 2147483648, %v1279_v2  ;;  %v1294_v26 = vand.u32 2147483647, %v1279_v2  ;;  %vm1290_vm2 = vweird.f32 %v1279_v2 }
 0x89d   :  { %v1297_v11 = vor.u32 1.1754944e-38, %v1296_v9  ;;  %vm1295_vm4 = vcmp.eq.f32.partialorder %v1294_v26, 8.507059e+37  ;;  %v1938_v26 = vld [vmem:[%s3608_s10 + $0x98] sm:$0xff] }
 0x8a1   :  { %v2160_v19 = vpop.eup %2159 }
 0x8a2   :  { %v1286_v20 = vmul.f32 %v2160_v19, %v1279_v2  ;;  %v1282_v22 = vpop.f32.mrf.mxu1  ;;  %vm1291_vm1 = vweird.f32 %v2160_v19  ;;  %v1937_v2 = vld [vmem:[%s3608_s10 + $0x90] sm:$0xff] }
 0x8a3   :  { %2161 = vrcp.f32 %v1282_v22  ;;  %vm1292_vm3 = vmor %vm1290_vm2, %vm1291_vm1  ;;  %v1311_v33 = vand.u32 2147483648, %v1282_v22  ;;  %v1309_v63 = vand.u32 2147483647, %v1282_v22  ;;  %vm1305_vm6 = vweird.f32 %v1282_v22  ;;  %1491 = vmatpush.msrb.mxu1 %v1937_v2  ;;  %v1994_v2 = vld [vmem:[%s3610_s12 + $0x310] sm:$0xff] }
 0x8a4   :  { %v1287_v15 = vsub.f32 1.0, %v1286_v20 }
 0x8a5   :  { %v1312_v29 = vor.u32 1.1754944e-38, %v1311_v33  ;;  %vm1310_vm8 = vcmp.eq.f32.partialorder %v1309_v63, 8.507059e+37  ;;  %v2134_v63 = vld [vmem:[%s3607_s9 + $0x1] ss:$0 sm:$0xff] }
 0x8a6   :  { %v1288_v16 = vmul.f32 %v2160_v19, %v1287_v15 }
 0x8a8   :  { %v1289_v6 = vadd.f32 %v2160_v19, %v1288_v16  ;;  %v1942_v16 = vld [vmem:[%s3608_s10 + $0xb8] sm:$0xff] }
 0x8a9   :  { %v2162_v25 = vpop.eup %2161 }
 0x8aa   :  { %v1301_v7 = vmul.f32 %v2162_v25, %v1282_v22  ;;  %v1293_v36 = vsel %vm1292_vm3, %v2160_v19, %v1289_v6  ;;  %vm1306_vm5 = vweird.f32 %v2162_v25  ;;  %v1950_v19 = vld [vmem:[%s3608_s10 + $0xf8] sm:$0xff] }
 0x8ab   :  { %v1298_v28 = vsel %vm1295_vm4, %v1297_v11, %v1293_v36  ;;  %vm1307_vm7 = vmor %vm1305_vm6, %vm1306_vm5  ;;  %v1946_v22 = vld [vmem:[%s3608_s10 + $0xd8] sm:$0xff] }
 0x8ac   :  { %v1302_v30 = vsub.f32 1.0, %v1301_v7  ;;  %v1256_v10 = vpop.f32.mrf.mxu0 }
 0x8ad   :  { %v1299_v13 = vmul.f32 %v1298_v28, %v1256_v10  ;;  %v1991_v10 = vld [vmem:[%s3610_s12 + $0x2f8] sm:$0xff] }
 0x8ae   :  { %v1303_v17 = vmul.f32 %v2162_v25, %v1302_v30  ;;  %v2133_v30 = vld [vmem:[%s3606_s8 + $0x1] ss:$0 sm:$0xff]  ;;  %1620 = vmatpush.msra.mxu1 %v1991_v10  ;;  %s2223_s8 = smov 8  }
 0x8af   :  { %1933 = vmatmul.msk.f32.vlgmr.msra.gmra.mxu2 %vm133_vm0, %v1299_v13  ;;  %v1990_v13 = vld [vmem:[%s3610_s12 + $0x2f0] sm:$0xff]  ;;  %v2016_v10 = vld [vmem:[%s3610_s12 + $0x3c0] sm:$0xff] }
 0x8b0   :  { %v1304_v34 = vadd.f32 %v2162_v25, %v1303_v17  ;;  %1511 = vmatpush.msra.mxu2 %v1950_v19  ;;  %1621 = vmatpush.msra.mxu1 %v1990_v13  ;;  %v2021_v19 = vld [vmem:[%s3610_s12 + $0x3e8] sm:$0xff]  ;;  %v2015_v13 = vld [vmem:[%s3610_s12 + $0x3b8] sm:$0xff] }
 0x8b2   :  { %v1308_v41 = vsel %vm1307_vm7, %v2162_v25, %v1304_v34  ;;  %1512 = vmatpush.msra.mxu2 %v1946_v22  ;;  %v1989_v34 = vld [vmem:[%s3610_s12 + $0x2e8] sm:$0xff] }
 0x8b3   :  { %v1313_v46 = vsel %vm1310_vm8, %v1312_v29, %v1308_v41  ;;  %v1975_v29 = vld [vmem:[%s3610_s12 + $0x278] sm:$0xff]  ;;  %v1974_v41 = vld [vmem:[%s3610_s12 + $0x270] sm:$0xff]  ;;  %1622 = vmatpush.msra.mxu1 %v1989_v34  ;;  %v1977_v22 = vld [vmem:[%s3610_s12 + $0x288] sm:$0xff] }
 0x8b4   :  { %v1259_v45 = vpop.f32.mrf.mxu0  ;;  %1513 = vmatpush.msra.mxu2 %v1942_v16  ;;  %1597 = vmatpush.msrb.mxu0 %v1975_v29  ;;  %v1963_v16 = vld [vmem:[%s3610_s12 + $0x218] sm:$0xff]  ;;  %v2010_v29 = vld [vmem:[%s3610_s12 + $0x390] sm:$0xff] }
 0x8b5   :  { %v1314_v47 = vmul.f32 %v1313_v46, %v1259_v45  ;;  %v1988_v45 = vld [vmem:[%s3610_s12 + $0x2e0] sm:$0xff]  ;;  %v2011_v34 = vld [vmem:[%s3610_s12 + $0x398] sm:$0xff] }
 0x8b6   :  { %1514 = vmatpush.msra.mxu2 %v1938_v26  ;;  %1598 = vmatpush.msrb.mxu0 %v1974_v41  ;;  %v1976_v26 = vld [vmem:[%s3610_s12 + $0x280] sm:$0xff] }
 0x8b7   :  { %1934 = vmatmul.msk.f32.gmra.mxu2 %vm133_vm0, %v1314_v47  ;;  %v1973_v47 = vld [vmem:[%s3610_s12 + $0x268] sm:$0xff]  ;;  %1623 = vmatpush.msra.mxu1 %v1988_v45  ;;  %v1951_v41 = vld [vmem:[%s3609_s11 + $0x1] ss:$2 sm:$0xf] }
 0x8b8   :  { %1599 = vmatpush.msrb.mxu0 %v1973_v47  ;;  %v2008_v45 = vld [vmem:[%s3610_s12 + $0x380] sm:$0xff]  ;;  %v1417_v47 = vperm.slane %v1951_v41, 1 }
 0x932   :  { %v1343_v50 = vpop.f32.mrf.mxu2 }
 0x933   :  { %v1349_v43 = vadd.f32 %v1343_v50, %v3105_v38 }
 0x935   :  { %v1353_v53 = vsel %vm133_vm0, %v1349_v43, 0.0 }
 0x93a   :  { %v1346_v48 = vpop.f32.mrf.mxu2 }
 0x93b   :  { %v1350_v56 = vadd.f32 %v1346_v48, %v3109_v49  ;;  %v2007_v48 = vld [vmem:[%s3610_s12 + $0x378] sm:$0xff] }
 0x93d   :  { %v1354_v61 = vsel %vm133_vm0, %v1350_v56, 0.0 }
 0x93e   :  { %v1355_v0 = vadd.f32 %v1354_v61, %v1353_v53  ;;  %v1972_v53 = vld [vmem:[%s3610_s12 + $0x260] sm:$0xff]  ;;  %v2006_v61 = vld [vmem:[%s3610_s12 + $0x370] sm:$0xff] }
 0x93f   :  { %1600 = vmatpush.msrb.mxu0 %v1972_v53 }
 0x940   :  { %v1356_v55 = vrot.slane %v1355_v0, 4 }
 0x942   :  { %v1357_v1 = vadd.f32 %v1356_v55, %v1355_v0  ;;  %v1986_v0 = vld [vmem:[%s3610_s12 + $0x2d0] sm:$0xff]  ;;  %v1971_v55 = vld [vmem:[%s3610_s12 + $0x258] sm:$0xff] }
 0x943   :  { %1601 = vmatpush.msrb.mxu0 %v1971_v55  ;;  %v1416_v55 = vperm.slane %v1951_v41, 0 }
 0x944   :  { %v1358_v60 = vrot.slane %v1357_v1, 2 }
 0x946   :  { %v1359_v4 = vadd.f32 %v1358_v60, %v1357_v1  ;;  %v2005_v60 = vld [vmem:[%s3610_s12 + $0x368] sm:$0xff] }
 0x948   :  { %v1360_v8 = vrot.slane %v1359_v4, 1 }
 0x94a   :  { %v1361_v51 = vadd.f32 %v1360_v8, %v1359_v4  ;;  %v1985_v4 = vld [vmem:[%s3610_s12 + $0x2c8] sm:$0xff]  ;;  %v1970_v8 = vld [vmem:[%s3610_s12 + $0x250] sm:$0xff] }
 0x94b   :  { %1602 = vmatpush.msrb.mxu0 %v1970_v8 }
 0x94c   :  { %v1362_v21 = vmul.f32 %v1361_v51, %v2737_v14  ;;  %v2023_v51 = vld [vmem:[%s3610_s12 + $0x3f8] sm:$0xff] }
 0x94d   :  { %1666 = vmatpush.msra.mxu3 %v2023_v51 }
 0x94e   :  { %v1363_v24 = vsub.f32 %v1349_v43, %v1362_v21  ;;  %v3250_v31 = vsub.f32 %v1350_v56, %v1362_v21  ;;  %v1987_v56 = vld [vmem:[%s3610_s12 + $0x2d8] sm:$0xff]  ;;  %v2004_v21 = vld [vmem:[%s3610_s12 + $0x360] sm:$0xff] }
 0x94f   :  { %1624 = vmatpush.msra.mxu1 %v1987_v56 }
 0x950   :  { %v1365_v38 = vmul.f32 %v1363_v24, %v1363_v24  ;;  %v1366_v49 = vmul.f32 %v3250_v31, %v3250_v31 }
 0x951   :  { %1625 = vmatpush.msra.mxu1 %v1986_v0 }
 0x952   :  { %v1367_v23 = vsel %vm133_vm0, %v1365_v38, 0.0  ;;  %v1368_v52 = vsel %vm133_vm0, %v1366_v49, 0.0  ;;  %v2003_v38 = vld [vmem:[%s3610_s12 + $0x358] sm:$0xff]  ;;  %v1984_v49 = vld [vmem:[%s3610_s12 + $0x2c0] sm:$0xff] }
 0x953   :  { %v1369_v58 = vadd.f32 %v1368_v52, %v1367_v23  ;;  %1626 = vmatpush.msra.mxu1 %v1985_v4  ;;  %v1969_v23 = vld [vmem:[%s3610_s12 + $0x248] sm:$0xff]  ;;  %v2002_v52 = vld [vmem:[%s3610_s12 + $0x350] sm:$0xff] }
 0x954   :  { %1603 = vmatpush.msrb.mxu0 %v1969_v23 }
 0x955   :  { %v1370_v27 = vrot.slane %v1369_v58, 4  ;;  %1627 = vmatpush.msra.mxu1 %v1984_v49 }
 0x957   :  { %v1371_v42 = vadd.f32 %v1370_v27, %v1369_v58  ;;  %v1983_v58 = vld [vmem:[%s3610_s12 + $0x2b8] sm:$0xff]  ;;  %v1968_v27 = vld [vmem:[%s3610_s12 + $0x240] sm:$0xff] }
 0x958   :  { %1628 = vmatpush.msra.mxu1 %v1983_v58  ;;  %1604 = vmatpush.msrb.mxu0 %v1968_v27 }
 0x959   :  { %v1372_v59 = vrot.slane %v1371_v42, 2 }
 0x95a   :  { %1605 = vmatpush.msrb.mxu0 %v1967_v37 }
 0x95b   :  { %v1373_v3 = vadd.f32 %v1372_v59, %v1371_v42  ;;  %v2001_v42 = vld [vmem:[%s3610_s12 + $0x348] sm:$0xff]  ;;  %v1982_v59 = vld [vmem:[%s3610_s12 + $0x2b0] sm:$0xff] }
 0x95c   :  { %1629 = vmatpush.msra.mxu1 %v1982_v59  ;;  %1606 = vmatpush.msrb.mxu0 %v1966_v54 }
 0x95d   :  { %v1374_v18 = vrot.slane %v1373_v3, 1 }
 0x95e   :  { %1630 = vmatpush.msra.mxu1 %v1981_v44  ;;  %1607 = vmatpush.msrb.mxu0 %v1965_v62 }
 0x95f   :  { %v1375_v20 = vadd.f32 %v1374_v18, %v1373_v3  ;;  %v1999_v3 = vld [vmem:[%s3610_s12 + $0x338] sm:$0xff]  ;;  %v1996_v18 = vld [vmem:[%s3610_s12 + $0x320] sm:$0xff] }
 0x960   :  { %1631 = vmatpush.msra.mxu1 %v1980_v5 }
 0x961   :  { %v1376_v15 = vmul.f32 %v1375_v20, %v2737_v14  ;;  %v1964_v20 = vld [vmem:[%s3610_s12 + $0x220] sm:$0xff] }
 0x962   :  { %1632 = vmatpush.msra.mxu1 %v1979_v12  ;;  %1608 = vmatpush.msrb.mxu0 %v1964_v20 }
 0x963   :  { %v1377_v9 = vadd.f32 1e-05, %v1376_v15  ;;  %v1993_v15 = vld [vmem:[%s3610_s12 + $0x308] sm:$0xff] }
 0x964   :  { %1633 = vmatpush.msra.mxu1 %v1978_v39  ;;  %1609 = vmatpush.msrb.mxu0 %v1963_v16 }
 0x965   :  { %2163 = vrsqrt.f32 %v1377_v9  ;;  %vm1384_vm10 = vweird.f32 %v1377_v9 }
 0x966   :  { %1634 = vmatpush.msra.mxu1 %v1977_v22 }
 0x968   :  { %1635 = vmatpush.msra.mxu1 %v1976_v26 }
 0x96b   :  { %v2164_v6 = vpop.eup %2163 }
 0x96c   :  { %v1379_v25 = vmul.f32 %v2164_v6, %v1377_v9  ;;  %vm1385_vm9 = vweird.f32 %v2164_v6  ;;  %v2020_v9 = vld [vmem:[%s3610_s12 + $0x3e0] sm:$0xff] }
 0x96d   :  { %vm1386_vm11 = vmor %vm1384_vm10, %vm1385_vm9 }
 0x96e   :  { %v1380_v11 = vmul.f32 %v2164_v6, %v1379_v25  ;;  %v2019_v25 = vld [vmem:[%s3610_s12 + $0x3d8] sm:$0xff] }
 0x970   :  { %v1381_v7 = vmul.f32 0.5, %v1380_v11  ;;  %v1962_v11 = vld [vmem:[%s3610_s12 + $0x210] sm:$0xff] }
 0x971   :  { %1610 = vmatpush.msrb.mxu0 %v1962_v11 }
 0x972   :  { %v1382_v36 = vsub.f32 1.5, %v1381_v7  ;;  %v2018_v7 = vld [vmem:[%s3610_s12 + $0x3d0] sm:$0xff] }
 0x974   :  { %v1383_v28 = vmul.f32 %v2164_v6, %v1382_v36  ;;  %v1961_v36 = vld [vmem:[%s3610_s12 + $0x208] sm:$0xff] }
 0x975   :  { %1611 = vmatpush.msrb.mxu0 %v1961_v36 }
 0x976   :  { %v1387_v33 = vsel %vm1386_vm11, %v2164_v6, %v1383_v28  ;;  %v1992_v6 = vld [vmem:[%s3610_s12 + $0x300] sm:$0xff]  ;;  %v2017_v28 = vld [vmem:[%s3610_s12 + $0x3c8] sm:$0xff] }
 0x977   :  { %v1388_v17 = vmul.f32 %v1387_v33, %v1363_v24  ;;  %v1389_v50 = vmul.f32 %v1387_v33, %v3250_v31  ;;  %v2022_v24 = vld [vmem:[%s3610_s12 + $0x3f0] sm:$0xff] }
 0x978   :  { %1667 = vmatpush.msra.mxu3 %v2022_v24  ;;  %v2014_v33 = vld [vmem:[%s3610_s12 + $0x3b0] sm:$0xff] }
 0x979   :  { %v1391_v46 = vmul.f32 %v2133_v30, %v1388_v17  ;;  %v1392_v1 = vmul.f32 %v2133_v30, %v1389_v50  ;;  %v1960_v30 = vld [vmem:[%s3610_s12 + $0x200] sm:$0xff]  ;;  %v2013_v17 = vld [vmem:[%s3610_s12 + $0x3a8] sm:$0xff]  ;;  %v1418_v50 = vperm.slane %v1951_v41, 2 }
 0x97a   :  { %1668 = vmatpush.msra.mxu3 %v2021_v19  ;;  %1612 = vmatpush.msrb.mxu0 %v1960_v30 }
 0x97b   :  { %v3333_v43 = vadd.f32 %v2134_v63, %v1391_v46  ;;  %v3377_v31 = vadd.f32 %v2134_v63, %v1392_v1  ;;  %v2012_v63 = vld [vmem:[%s3610_s12 + $0x3a0] sm:$0xff]  ;;  %v2009_v46 = vld [vmem:[%s3610_s12 + $0x388] sm:$0xff] }
 0x97c   :  { %1669 = vmatpush.msra.mxu3 %v2020_v9 }
 0x97d   :  { %1952 = vmatmul.msk.f32.vlgmr.msrb.gmra.mxu2 %vm133_vm0, %v3333_v43  ;;  %1954 = vmatmul.msk.f32.vlgmr.msra.gmra.mxu0 %vm133_vm0, %v3333_v43 }
 0x97e   :  { %1956 = vmatmul.msk.f32.vlgmr.msrb.gmra.mxu1 %vm133_vm0, %v3333_v43  ;;  %1643 = vmatpush.msrb.mxu2 %v2007_v48 }
 0x97f   :  { %1670 = vmatpush.msra.mxu3 %v2019_v25 }
 0x980   :  { %1644 = vmatpush.msrb.mxu2 %v2006_v61 }
 0x981   :  { %1671 = vmatpush.msra.mxu3 %v2018_v7 }
 0x982   :  { %1645 = vmatpush.msrb.mxu2 %v2005_v60 }
 0x983   :  { %1672 = vmatpush.msra.mxu3 %v2017_v28 }
 0x984   :  { %1646 = vmatpush.msrb.mxu2 %v2004_v21 }
 0x985   :  { %1953 = vmatmul.msk.f32.gmra.mxu2 %vm133_vm0, %v3377_v31  ;;  %1955 = vmatmul.msk.f32.gmra.mxu0 %vm133_vm0, %v3377_v31 }
 0x986   :  { %1957 = vmatmul.msk.f32.gmra.mxu1 %vm133_vm0, %v3377_v31  ;;  %1647 = vmatpush.msrb.mxu2 %v2003_v38 }
 0x987   :  { %1673 = vmatpush.msra.mxu3 %v2016_v10 }
 0x988   :  { %1648 = vmatpush.msrb.mxu2 %v2002_v52 }
 0x989   :  { %1674 = vmatpush.msra.mxu3 %v2015_v13 }
 0x98a   :  { %1649 = vmatpush.msrb.mxu2 %v2001_v42  ;;  %v1419_v42 = vperm.slane %v1951_v41, 3 }
 0x98b   :  { %1675 = vmatpush.msra.mxu3 %v2014_v33 }
 0x98c   :  { %1650 = vmatpush.msrb.mxu2 %v2000_v35 }
 0x98d   :  { %1958 = vmatmul.msk.f32.vlgmr.msra.gmra.mxu2 %vm133_vm0, %v3333_v43  ;;  %1676 = vmatpush.msra.mxu3 %v2013_v17 }
 0x98e   :  { %1651 = vmatpush.msrb.mxu2 %v1999_v3 }
 0x98f   :  { %1677 = vmatpush.msra.mxu3 %v2012_v63 }
 0x990   :  { %1652 = vmatpush.msrb.mxu2 %v1998_v57  ;;  %v2135_v57 = vld [vmem:[%s3611_s13 + $0x1] ss:$0 sm:$0xff] }
 0x991   :  { %1678 = vmatpush.msra.mxu3 %v2011_v34 }
 0x992   :  { %1653 = vmatpush.msrb.mxu2 %v1997_v40 }
 0x993   :  { %1679 = vmatpush.msra.mxu3 %v2010_v29 }
 0x994   :  { %1654 = vmatpush.msrb.mxu2 %v1996_v18 }
 0x995   :  { %1959 = vmatmul.msk.f32.gmra.mxu2 %vm133_vm0, %v3377_v31  ;;  %1680 = vmatpush.msra.mxu3 %v2009_v46 }
 0x996   :  { %1655 = vmatpush.msrb.mxu2 %v1995_v32 }
 0x997   :  { %1681 = vmatpush.msra.mxu3 %v2008_v45 }
 0x998   :  { %1656 = vmatpush.msrb.mxu2 %v1994_v2 }
 0x99a   :  { %1657 = vmatpush.msrb.mxu2 %v1993_v15 }
 0x99c   :  { %1658 = vmatpush.msrb.mxu2 %v1992_v6 }
 0x9fa   :  { %v1470_v48 = vpop.f32.mrf.mxu0 }
 0x9fb   :  { %v1471_v56 = vadd.f32 %v1470_v48, %v1417_v47  ;;  %v1493_v53 = vpop.f32.mrf.mxu1 }
 0x9fc   :  { %v1494_v61 = vadd.f32 %v1493_v53, %v1418_v50  ;;  %v1739_v53 = vld [vmem:[%s3614_s16 + $0x18] sm:$0xff] }
 0x9fd   :  { %v1523_v0 = vmax.f32 %v1471_v56, 0.0  ;;  %1762 = vmatpush.msra.mxu0 %v1739_v53 }
 0x9fe   :  { %v1524_v1 = vmax.f32 %v1494_v61, 0.0  ;;  %v1738_v61 = vld [vmem:[%s3614_s16 + $0x10] sm:$0xff] }
 0x9ff   :  { %1636 = vmatmul.f32.vlgmr.msra.gmra.mxu1 %v1523_v0  ;;  %1763 = vmatpush.msra.mxu0 %v1738_v61 }
 0xa00   :  { %1659 = vmatmul.f32.vlgmr.msrb.gmra.mxu2 %v1524_v1  ;;  %v1447_v60 = vpop.f32.mrf.mxu2 }
 0xa01   :  { %v1448_v4 = vadd.f32 %v1447_v60, %v1416_v55  ;;  %v1736_v60 = vld [vmem:[%s3614_s16] sm:$0xff] }
 0xa02   :  { %v1473_v8 = vpop.f32.mrf.mxu0 }
 0xa03   :  { %v1522_v51 = vmax.f32 %v1448_v4, 0.0  ;;  %v1474_v21 = vadd.f32 %v1473_v8, %v1417_v47  ;;  %v1496_v24 = vpop.f32.mrf.mxu1 }
 0xa04   :  { %v1497_v38 = vadd.f32 %v1496_v24, %v1418_v50  ;;  %v1777_v24 = vld [vmem:[%s3616_s18 + $0x10] sm:$0xff] }
 0xa05   :  { %v1527_v49 = vmax.f32 %v1474_v21, 0.0  ;;  %1613 = vmatmul.f32.vlgmr.msrb.gmra.mxu0 %v1522_v51  ;;  %v1778_v21 = vld [vmem:[%s3616_s18 + $0x18] sm:$0xff] }
 0xa06   :  { %v1528_v23 = vmax.f32 %v1497_v38, 0.0  ;;  %1801 = vmatpush.msrb.mxu1 %v1778_v21  ;;  %2030 = vmatpush.msrb.mxu3 %v1778_v21 }
 0xa07   :  { %1639 = vmatmul.f32.gmra.mxu1 %v1527_v49 }
 0xa08   :  { %1662 = vmatmul.f32.gmra.mxu2 %v1528_v23  ;;  %v1450_v52 = vpop.f32.mrf.mxu2  ;;  %1802 = vmatpush.msrb.mxu1 %v1777_v24 }
 0xa09   :  { %v1451_v58 = vadd.f32 %v1450_v52, %v1416_v55  ;;  %v1737_v55 = vld [vmem:[%s3614_s16 + $0x8] sm:$0xff]  ;;  %2031 = vmatpush.msrb.mxu3 %v1777_v24 }
 0xa0a   :  { %1764 = vmatpush.msra.mxu0 %v1737_v55 }
 0xa0b   :  { %v1526_v27 = vmax.f32 %v1451_v58, 0.0 }
 0xa0c   :  { %1765 = vmatpush.msra.mxu0 %v1736_v60 }
 0xa0d   :  { %1616 = vmatmul.f32.gmra.mxu0 %v1526_v27  ;;  %v2136_v27 = vld [vmem:[%s3612_s14 + $0x1] ss:$0 sm:$0xff] }
 0xa10   :  { %v1516_v59 = vpop.f32.mrf.mxu2 }
 0xa11   :  { %v1517_v37 = vadd.f32 %v1516_v59, %v1419_v42 }
 0xa13   :  { %v1525_v35 = vmax.f32 %v1517_v37, 0.0  ;;  %v2137_v37 = vld [vmem:[%s3613_s15 + $0x1] ss:$0 sm:$0xff] }
 0xa15   :  { %1682 = vmatmul.f32.vlgmr.msra.gmra.mxu3 %v1525_v35 }
 0xa18   :  { %v1519_v44 = vpop.f32.mrf.mxu2 }
 0xa19   :  { %v1520_v3 = vadd.f32 %v1519_v44, %v1419_v42 }
 0xa1b   :  { %v1529_v54 = vmax.f32 %v1520_v3, 0.0 }
 0xa1d   :  { %1685 = vmatmul.f32.gmra.mxu3 %v1529_v54 }
 0xa7c   :  { %v1637_v12 = vpop.f32.mrf.mxu1 }
 0xa82   :  { %v1614_v5 = vpop.f32.mrf.mxu0 }
 0xa83   :  { %v1615_v40 = vadd.f32 %v2135_v57, %v1614_v5  ;;  %v1660_v18 = vpop.f32.mrf.mxu2 }
 0xa84   :  { %v1640_v19 = vpop.f32.mrf.mxu1 }
 0xa85   :  { %v1638_v62 = vadd.f32 %v1637_v12, %v1615_v40  ;;  %v1775_v12 = vld [vmem:[%s3616_s18] sm:$0xff]  ;;  %v1817_v40 = vld [vmem:[%s3618_s20 + $0x18] sm:$0xff] }
 0xa86   :  { %1840 = vmatpush.msra.mxu2 %v1817_v40 }
 0xa87   :  { %v1661_v20 = vadd.f32 %v1660_v18, %v1638_v62  ;;  %v1816_v18 = vld [vmem:[%s3618_s20 + $0x10] sm:$0xff] }
 0xa88   :  { %1841 = vmatpush.msra.mxu2 %v1816_v18 }
 0xa8a   :  { %v1617_v32 = vpop.f32.mrf.mxu0 }
 0xa8b   :  { %v1618_v39 = vadd.f32 %v2135_v57, %v1617_v32  ;;  %v1663_v9 = vpop.f32.mrf.mxu2  ;;  %v1776_v57 = vld [vmem:[%s3616_s18 + $0x8] sm:$0xff]  ;;  %v2138_v32 = vld [vmem:[%s3615_s17] ss:$0 sm:$0xff] }
 0xa8c   :  { %1803 = vmatpush.msrb.mxu1 %v1776_v57  ;;  %2032 = vmatpush.msrb.mxu3 %v1776_v57 }
 0xa8d   :  { %v1641_v22 = vadd.f32 %v1640_v19, %v1618_v39 }
 0xa8e   :  { %1804 = vmatpush.msrb.mxu1 %v1775_v12  ;;  %2033 = vmatpush.msrb.mxu3 %v1775_v12 }
 0xa8f   :  { %v1664_v16 = vadd.f32 %v1663_v9, %v1641_v22  ;;  %v1814_v9 = vld [vmem:[%s3618_s20] sm:$0xff] }
 0xa98   :  { %v1683_v2 = vpop.f32.mrf.mxu3 }
 0xa99   :  { %v1684_v15 = vadd.f32 %v1683_v2, %v1661_v20 }
 0xa9b   :  { %v1689_v6 = vadd.f32 %v1684_v15, %v3333_v43  ;;  %v1815_v15 = vld [vmem:[%s3618_s20 + $0x8] sm:$0xff] }
 0xa9c   :  { %1842 = vmatpush.msra.mxu2 %v1815_v15 }
 0xa9d   :  { %v1693_v7 = vsel %vm133_vm0, %v1689_v6, 0.0 }
 0xa9e   :  { %1843 = vmatpush.msra.mxu2 %v1814_v9 }
 0xaa0   :  { %v1686_v26 = vpop.f32.mrf.mxu3 }
 0xaa1   :  { %v1687_v25 = vadd.f32 %v1686_v26, %v1664_v16  ;;  %v2139_v16 = vld [vmem:[%s3617_s19] ss:$0 sm:$0xff]  ;;  %s2221_s19 = smov [#allocation2]  }
 0xaa2   :  { %s1861_s20 = sshll.u32 %s2221_s19, 4  ;;  %s1862_s20 = int_to_ptr.vmem [resolvable:$true] %s1861_s20 }
 0xaa3   :  { %v1690_v11 = vadd.f32 %v1687_v25, %v3377_v31 }
 0xaa5   :  { %v1694_v36 = vsel %vm133_vm0, %v1690_v11, 0.0 }
 0xaa6   :  { %v1695_v28 = vadd.f32 %v1694_v36, %v1693_v7 }
 0xaa8   :  { %v1696_v30 = vrot.slane %v1695_v28, 4 }
 0xaaa   :  { %v1697_v10 = vadd.f32 %v1696_v30, %v1695_v28  ;;  %v2140_v28 = vld [vmem:[%s3619_s21] ss:$0 sm:$0xff]  ;;  %s2222_s21 = smov 128  }
 0xaac   :  { %v1698_v13 = vrot.slane %v1697_v10, 2 }
 0xaae   :  { %v1699_v33 = vadd.f32 %v1698_v13, %v1697_v10 }
 0xab0   :  { %v1700_v17 = vrot.slane %v1699_v33, 1 }
 0xab2   :  { %v1701_v63 = vadd.f32 %v1700_v17, %v1699_v33 }
 0xab4   :  { %v1702_v34 = vmul.f32 %v1701_v63, %v2737_v14 }
 0xab6   :  { %v1703_v29 = vsub.f32 %v1689_v6, %v1702_v34  ;;  %v1704_v41 = vsub.f32 %v1690_v11, %v1702_v34 }
 0xab8   :  { %v1705_v46 = vmul.f32 %v1703_v29, %v1703_v29  ;;  %v1706_v43 = vmul.f32 %v1704_v41, %v1704_v41 }
 0xaba   :  { %v1707_v45 = vsel %vm133_vm0, %v1705_v46, 0.0  ;;  %v1708_v31 = vsel %vm133_vm0, %v1706_v43, 0.0 }
 0xabb   :  { %v1709_v47 = vadd.f32 %v1708_v31, %v1707_v45 }
 0xabd   :  { %v1710_v50 = vrot.slane %v1709_v47, 4 }
 0xabf   :  { %v1711_v48 = vadd.f32 %v1710_v50, %v1709_v47 }
 0xac1   :  { %v1712_v56 = vrot.slane %v1711_v48, 2 }
 0xac3   :  { %v1713_v0 = vadd.f32 %v1712_v56, %v1711_v48 }
 0xac5   :  { %v1714_v1 = vrot.slane %v1713_v0, 1 }
 0xac7   :  { %v1715_v4 = vadd.f32 %v1714_v1, %v1713_v0 }
 0xac9   :  { %v1716_v8 = vmul.f32 %v1715_v4, %v2737_v14 }
 0xacb   :  { %v1717_v51 = vadd.f32 1e-05, %v1716_v8 }
 0xacd   :  { %2165 = vrsqrt.f32 %v1717_v51  ;;  %vm1724_vm13 = vweird.f32 %v1717_v51 }
 0xad3   :  { %v2166_v38 = vpop.eup %2165 }
 0xad4   :  { %v1719_v49 = vmul.f32 %v2166_v38, %v1717_v51  ;;  %vm1725_vm12 = vweird.f32 %v2166_v38 }
 0xad5   :  { %vm1726_vm14 = vmor %vm1724_vm13, %vm1725_vm12 }
 0xad6   :  { %v1720_v23 = vmul.f32 %v2166_v38, %v1719_v49 }
 0xad8   :  { %v1721_v52 = vmul.f32 0.5, %v1720_v23 }
 0xada   :  { %v1722_v58 = vsub.f32 1.5, %v1721_v52 }
 0xadc   :  { %v1723_v14 = vmul.f32 %v2166_v38, %v1722_v58 }
 0xade   :  { %v1727_v42 = vsel %vm1726_vm14, %v2166_v38, %v1723_v14 }
 0xadf   :  { %v1728_v59 = vmul.f32 %v1727_v42, %v1703_v29  ;;  %v1729_v44 = vmul.f32 %v1727_v42, %v1704_v41 }
 0xae1   :  { %v1731_v35 = vmul.f32 %v2136_v27, %v1728_v59  ;;  %v1732_v54 = vmul.f32 %v2136_v27, %v1729_v44 }
 0xae3   :  { %v1734_v3 = vadd.f32 %v2137_v37, %v1731_v35  ;;  %v1735_v5 = vadd.f32 %v2137_v37, %v1732_v54 }
 0xae5   :  { %2024 = vmatmul.msk.f32.vlgmr.msra.gmra.mxu0 %vm133_vm0, %v1734_v3 }
 0xaed   :  { %2025 = vmatmul.msk.f32.gmra.mxu0 %vm133_vm0, %v1735_v5 }
 0xb62   :  { %v1767_v62 = vpop.f32.mrf.mxu0 }
 0xb63   :  { %v1768_v39 = vadd.f32 %v2138_v32, %v1767_v62 }
 0xb65   :  { %v1773_v2 = vmax.f32 %v1768_v39, 0.0 }
 0xb67   :  { %2026 = vmatmul.msk.f32.vlgmr.msrb.gmra.mxu1 %vm133_vm0, %v1773_v2 }
 0xb6a   :  { %v1770_v19 = vpop.f32.mrf.mxu0 }
 0xb6b   :  { %v1771_v20 = vadd.f32 %v2138_v32, %v1770_v19 }
 0xb6d   :  { %v1774_v22 = vmax.f32 %v1771_v20, 0.0 }
 0xb6f   :  { %2027 = vmatmul.msk.f32.vlgmr.msrb.gmra.mxu3 %vm133_vm0, %v1774_v22 }
 0xbe4   :  { %v1806_v26 = vpop.f32.mrf.mxu1 }
 0xbe5   :  { %v1807_v6 = vadd.f32 %v2139_v16, %v1806_v26 }
 0xbe7   :  { %v1812_v25 = vmax.f32 %v1807_v6, 0.0 }
 0xbe9   :  { %2028 = vmatmul.msk.f32.vlgmr.msra.gmra.mxu2 %vm133_vm0, %v1812_v25 }
 0xbf2   :  { %v1809_v11 = vpop.f32.mrf.mxu3 }
 0xbf3   :  { %v1810_v7 = vadd.f32 %v2139_v16, %v1809_v11 }
 0xbf5   :  { %v1813_v36 = vmax.f32 %v1810_v7, 0.0 }
 0xbf7   :  { %2029 = vmatmul.msk.f32.gmra.mxu2 %vm133_vm0, %v1813_v36 }
 0xc6c   :  { %v1845_v30 = vpop.f32.mrf.mxu2 }
 0xc6d   :  { %v1846_v10 = vadd.f32 %v2140_v28, %v1845_v30 }
 0xc6f   :  { %2167 = vtanh.f32 %v1846_v10 }
 0xc75   :  { %v2168_v13 = vpop.eup %2167 }
 0xc76   :  { %v1853_v33 = vmul.f32 10.0, %v2168_v13 }
 0xc78   :  { %1855 = vst [vmem:[#allocation2] sm:$0xff] %v1853_v33 }
 0xc7a   :  { %v1848_v17 = vpop.f32.mrf.mxu2 }
 0xc7b   :  { %v1849_v63 = vadd.f32 %v2140_v28, %v1848_v17 }
 0xc7d   :  { %2169 = vtanh.f32 %v1849_v63 }
 0xc83   :  { %v2170_v34 = vpop.eup %2169 }
 0xc84   :  { %v1854_v29 = vmul.f32 10.0, %v2170_v34 }
 0xc86   :  { %1856 = vst [vmem:[#allocation2 + $0x8] sm:$0xff] %v1854_v29 }
 0xc87   :  { %1869 = dma.vmem_to_hbm [thread:$0]  %s1862_s20, 256, %s1864_s2, [#allocation3], %s2222_s21, %s2222_s21, %s2223_s8  }
 0xc88   :  { %2213 = dma.done.wait [#allocation3], 256  }
 0xc89   :  { %2214 = vsyncadd [#allocation3], 4294967040 }
 0xc8a   :  { %1874 = vsyncpa [#allocation3], 1 }

</bundles_post_ra>
